<compile_context>
chip_gen: v7x
topology: tpu7x:2x2x1
jax: 0.10.0
libtpu: 0.0.40
codegen_flags: <defaults>
</compile_context>

<pallas_src>
import functools

import jax
import jax.numpy as jnp
from jax import lax
from jax.experimental import pallas as pl
from jax.experimental.pallas import tpu as pltpu

LANE = 128


def _round_up(x, m):
    return (x + m - 1) // m * m


# ---------------------------------------------------------------------------
# Pallas kernels
# ---------------------------------------------------------------------------
def _matmul_bias_kernel(x_ref, w_ref, b_ref, o_ref, *, apply_relu):
    acc = jnp.dot(x_ref[...], w_ref[...], preferred_element_type=jnp.float32)
    acc = acc + b_ref[...]                       # (1, N) broadcast over rows
    if apply_relu:
        acc = jnp.maximum(acc, 0.0)
    o_ref[...] = acc.astype(o_ref.dtype)


def _fused_fc_kernel(x_ref, w1_ref, b1_ref, w2_ref, b2_ref, o_ref):
    h = jnp.dot(x_ref[...], w1_ref[...], preferred_element_type=jnp.float32)
    h = jnp.maximum(h + b1_ref[...], 0.0)
    q = jnp.dot(h.astype(w2_ref.dtype), w2_ref[...],
                preferred_element_type=jnp.float32)
    o_ref[...] = (q + b2_ref[...]).astype(o_ref.dtype)


# ---------------------------------------------------------------------------
# Pallas wrappers (M-tiled, parallel grid, weights VMEM-resident)
# ---------------------------------------------------------------------------
def pallas_matmul_bias(x, w, b, *, apply_relu, out_dtype, tm=512):
    """y = relu?(x @ w + b).  x:(M,K) bf16, w:(K,N) bf16, b:(1,N) f32."""
    M, K = x.shape
    Kw, N = w.shape
    assert K == Kw, (K, Kw)
    TM = min(tm, _round_up(M, 16))
    Mp = _round_up(M, TM)
    if Mp != M:
        x = jnp.pad(x, ((0, Mp - M), (0, 0)))
    out = pl.pallas_call(
        functools.partial(_matmul_bias_kernel, apply_relu=apply_relu),
        out_shape=jax.ShapeDtypeStruct((Mp, N), out_dtype),
        grid=(Mp // TM,),
        in_specs=[
            pl.BlockSpec((TM, K), lambda i: (i, 0)),   # activations: tiled over M
            pl.BlockSpec((K, N), lambda i: (0, 0)),    # weight: resident
            pl.BlockSpec((1, N), lambda i: (0, 0)),    # bias (lane-dense, N%128==0)
        ],
        out_specs=pl.BlockSpec((TM, N), lambda i: (i, 0)),
        compiler_params=pltpu.CompilerParams(dimension_semantics=("parallel",)),
    )(x.astype(jnp.bfloat16), w, b)
    return out[:M] if Mp != M else out


def pallas_fused_fc(x, w1, b1, w2, b2, *, tm=256):
    """q = (relu(x @ w1 + b1)) @ w2 + b2, one pallas_call."""
    M, K1 = x.shape
    N1 = w1.shape[1]
    N2 = w2.shape[1]
    TM = min(tm, _round_up(M, 16))
    Mp = _round_up(M, TM)
    if Mp != M:
        x = jnp.pad(x, ((0, Mp - M), (0, 0)))
    out = pl.pallas_call(
        _fused_fc_kernel,
        out_shape=jax.ShapeDtypeStruct((Mp, N2), jnp.float32),
        grid=(Mp // TM,),
        in_specs=[
            pl.BlockSpec((TM, K1), lambda i: (i, 0)),
            pl.BlockSpec((K1, N1), lambda i: (0, 0)),
            pl.BlockSpec((1, N1), lambda i: (0, 0)),
            pl.BlockSpec((N1, N2), lambda i: (0, 0)),
            pl.BlockSpec((1, N2), lambda i: (0, 0)),
        ],
        out_specs=pl.BlockSpec((TM, N2), lambda i: (i, 0)),
        compiler_params=pltpu.CompilerParams(dimension_semantics=("parallel",)),
    )(x.astype(jnp.bfloat16), w1, b1, w2, b2)
    return out[:M] if Mp != M else out


# ---------------------------------------------------------------------------
# im2col glue (pure slicing / reshape) + conv-as-matmul wrapper
# ---------------------------------------------------------------------------
def _im2col(x_nhwc, kh, kw, stride):
    n, h, w, c = x_nhwc.shape
    ho = (h - kh) // stride + 1
    wo = (w - kw) // stride + 1
    cols = []
    for i in range(kh):
        for j in range(kw):
            cols.append(
                lax.slice(
                    x_nhwc,
                    (0, i, j, 0),
                    (n, i + stride * (ho - 1) + 1, j + stride * (wo - 1) + 1, c),
                    (1, stride, stride, 1),
                )
            )
    # columns ordered (kh, kw, cin); rows ordered (n, ho, wo)
    pat = jnp.concatenate(cols, axis=-1)
    return pat.reshape(n * ho * wo, kh * kw * c), (n, ho, wo)


def conv2d_relu_pallas(x_nhwc, w2d, b2d, kh, kw, stride):
    """VALID conv + ReLU; w2d is the pre-padded (Kp, Cout_p) bf16 matrix."""
    cols, (n, ho, wo) = _im2col(x_nhwc, kh, kw, stride)
    k = cols.shape[1]
    kp = w2d.shape[0]
    if kp != k:
        cols = jnp.pad(cols, ((0, 0), (0, kp - k)))
    out = pallas_matmul_bias(cols, w2d, b2d, apply_relu=True,
                             out_dtype=jnp.bfloat16)
    return out.reshape(n, ho, wo, w2d.shape[1])


# ---------------------------------------------------------------------------
# Parameters: torch-layout init + one-time kernel-ready prep
# ---------------------------------------------------------------------------
def _conv_out_len(h, k, s):
    return (h - k) // s + 1


def init_dqn_params(key, input_shape, n_actions):
    c_in, h, w = input_shape
    h1, w1 = _conv_out_len(h, 8, 4), _conv_out_len(w, 8, 4)
    h2, w2 = _conv_out_len(h1, 4, 2), _conv_out_len(w1, 4, 2)
    h3, w3 = _conv_out_len(h2, 3, 1), _conv_out_len(w2, 3, 1)
    conv_out_size = 64 * h3 * w3

    keys = jax.random.split(key, 10)

    def uinit(k, shape, fan_in):
        bound = 1.0 / float(fan_in) ** 0.5
        return jax.random.uniform(k, shape, jnp.float32, -bound, bound)

    params = {
        "w1": uinit(keys[0], (32, c_in, 8, 8), c_in * 8 * 8),
        "b1": uinit(keys[1], (32,), c_in * 8 * 8),
        "w2": uinit(keys[2], (64, 32, 4, 4), 32 * 4 * 4),
        "b2": uinit(keys[3], (64,), 32 * 4 * 4),
        "w3": uinit(keys[4], (64, 64, 3, 3), 64 * 3 * 3),
        "b3": uinit(keys[5], (64,), 64 * 3 * 3),
        # FC weights stored as (in, out) == torch weight.T
        "fc1_w": uinit(keys[6], (conv_out_size, 512), conv_out_size),
        "fc1_b": uinit(keys[7], (512,), conv_out_size),
        "fc2_w": uinit(keys[8], (512, n_actions), 512),
        "fc2_b": uinit(keys[9], (512,), 512)[:n_actions] * 0 + uinit(keys[9], (n_actions,), 512),
    }
    # keep fc2_b simple & deterministic
    params["fc2_b"] = uinit(keys[9], (n_actions,), 512)
    return params, (h3, w3)


def _prep_conv_weight(w_oihw, b, cin_act):
    """(Cout,Cin,KH,KW) -> (Kp, Cout_p) bf16 matmul weight + (1, Cout_p) f32 bias.

    cin_act = channel count of the (possibly zero-padded) NHWC activation.
    """
    cout, cin_w, kh, kw = w_oihw.shape
    cout_p = _round_up(cout, LANE)
    w = jnp.transpose(w_oihw, (2, 3, 1, 0))               # (kh, kw, cin_w, cout)
    w = jnp.pad(w, ((0, 0), (0, 0), (0, cin_act - cin_w), (0, cout_p - cout)))
    k = kh * kw * cin_act
    kp = _round_up(k, LANE)
    w2d = jnp.pad(w.reshape(k, cout_p), ((0, kp - k), (0, 0))).astype(jnp.bfloat16)
    b2d = jnp.pad(b, (0, cout_p - cout)).astype(jnp.float32).reshape(1, cout_p)
    return w2d, b2d


def prepare_params(params, input_shape, n_actions, conv3_hw):
    """One-time reshape / pad / row-permute / bf16-cast of all weights."""
    c_in = input_shape[0]
    h3, w3 = conv3_hw
    cpad = _round_up(64, LANE)          # padded channel width carried through convs

    prep = {}
    prep["c1_w"], prep["c1_b"] = _prep_conv_weight(params["w1"], params["b1"], c_in)
    prep["c2_w"], prep["c2_b"] = _prep_conv_weight(params["w2"], params["b2"],
                                                   _round_up(32, LANE))
    prep["c3_w"], prep["c3_b"] = _prep_conv_weight(params["w3"], params["b3"],
                                                   _round_up(64, LANE))

    # fc1: fold the torch CHW-flatten into the weight rows (-> HWC order) and
    # zero-pad rows for the padded conv3 channels.
    nh = params["fc1_w"].shape[1]
    w1 = params["fc1_w"].reshape(64, h3, w3, nh).transpose(1, 2, 0, 3)  # (h3,w3,c,nh)
    w1 = jnp.pad(w1, ((0, 0), (0, 0), (0, cpad - 64), (0, 0)))
    prep["fc1_w"] = w1.reshape(h3 * w3 * cpad, nh).astype(jnp.bfloat16)
    prep["fc1_b"] = params["fc1_b"].astype(jnp.float32).reshape(1, nh)

    # fc2: pad the output (n_actions) to 128 lanes; sliced off after the kernel.
    na_p = _round_up(n_actions, LANE)
    prep["fc2_w"] = jnp.pad(params["fc2_w"],
                            ((0, 0), (0, na_p - n_actions))).astype(jnp.bfloat16)
    prep["fc2_b"] = jnp.pad(params["fc2_b"],
                            (0, na_p - n_actions)).astype(jnp.float32).reshape(1, na_p)
    prep["n_actions"] = n_actions       # plain Python int (closed over, not traced)
    return prep


# ---------------------------------------------------------------------------
# Forward pass (Pallas) and pure-JAX reference
# ---------------------------------------------------------------------------
def dqn_forward(prep, x_nchw):
    x = jnp.transpose(x_nchw, (0, 2, 3, 1)).astype(jnp.bfloat16)   # NCHW -> NHWC
    x = conv2d_relu_pallas(x, prep["c1_w"], prep["c1_b"], 8, 8, 4)
    x = conv2d_relu_pallas(x, prep["c2_w"], prep["c2_b"], 4, 4, 2)
    x = conv2d_relu_pallas(x, prep["c3_w"], prep["c3_b"], 3, 3, 1)
    n, h3, w3, cpad = x.shape
    x = x.reshape(n, h3 * w3 * cpad)    # HWC flatten matches row-permuted fc1_w
    q = pallas_fused_fc(x, prep["fc1_w"], prep["fc1_b"],
                        prep["fc2_w"], prep["fc2_b"])
    return q[:, :prep["n_actions"]]


def dqn_reference(params, x_nchw):
    dn = ("NCHW", "OIHW", "NCHW")

    def conv(x, w, b, s):
        y = lax.conv_general_dilated(x, w, (s, s), "VALID", dimension_numbers=dn)
        return jnp.maximum(y + b[None, :, None, None], 0.0)

    y = conv(x_nchw, params["w1"], params["b1"], 4)
    y = conv(y, params["w2"], params["b2"], 2)
    y = conv(y, params["w3"], params["b3"], 1)
    y = y.reshape(y.shape[0], -1)                    # torch .view(N, -1) on NCHW
    y = jnp.maximum(y @ params["fc1_w"] + params["fc1_b"], 0.0)
    return y @ params["fc2_w"] + params["fc2_b"]


# ---------------------------------------------------------------------------
if __name__ == "__main__":
    # Small but conv-valid shapes: 36x36 -> 8x8 -> 3x3 -> 1x1 spatially.
    batch, in_ch, spatial, n_actions = 2, 4, 36, 4
    input_shape = (in_ch, spatial, spatial)

    key = jax.random.PRNGKey(0)
    pkey, xkey = jax.random.split(key)
    params, conv3_hw = init_dqn_params(pkey, input_shape, n_actions)
    prep = prepare_params(params, input_shape, n_actions, conv3_hw)

    x = jax.random.normal(xkey, (batch, in_ch, spatial, spatial), jnp.float32)

    fwd = jax.jit(functools.partial(dqn_forward, prep))
    q = jax.block_until_ready(fwd(x))
    q_ref = jax.block_until_ready(dqn_reference(params, x))

    assert q.shape == (batch, n_actions), q.shape
    scale = float(jnp.maximum(jnp.max(jnp.abs(q_ref)), 1e-3))
    max_err = float(jnp.max(jnp.abs(q - q_ref)))
    assert max_err / scale < 5e-2, ("mismatch vs reference", max_err, scale)

    print("KERNEL_OK")
</pallas_src>

<mosaic_0001>
module attributes {stable_mosaic.version = 11 : i64} {
  func.func @_matmul_bias_kernel(%arg0: i32, %arg1: memref<128x256xbf16, #tpu.memory_space<vmem>>, %arg2: memref<256x128xbf16, #tpu.memory_space<vmem>>, %arg3: memref<1x128xf32, #tpu.memory_space<vmem>>, %arg4: memref<128x128xbf16, #tpu.memory_space<vmem>>) attributes {dimension_semantics = [#tpu.dimension_semantics<parallel>], iteration_bounds = array<i64: 1>, scalar_prefetch = 0 : i64, scratch_operands = 0 : i64, tpu.core_type = #tpu.core_type<tc>, window_params = [{transform_indices = @transform_0, window_bounds = array<i64: 128, 256>}, {pipeline_mode = #tpu.pipeline_mode<synchronous>, transform_indices = @transform_1, window_bounds = array<i64: 256, 128>}, {pipeline_mode = #tpu.pipeline_mode<synchronous>, transform_indices = @transform_2, window_bounds = array<i64: 1, 128>}, {transform_indices = @transform_3, window_bounds = array<i64: 128, 128>}]} {
    %c0 = arith.constant 0 : index
    %c0_0 = arith.constant 0 : index
    %0 = vector.load %arg1[%c0, %c0_0] : memref<128x256xbf16, #tpu.memory_space<vmem>>, vector<128x256xbf16>
    %c0_1 = arith.constant 0 : index
    %c0_2 = arith.constant 0 : index
    %1 = vector.load %arg2[%c0_1, %c0_2] : memref<256x128xbf16, #tpu.memory_space<vmem>>, vector<256x128xbf16>
    %cst = arith.constant dense<0.000000e+00> : vector<128x128xf32>
    %2 = tpu.matmul %0, %1, %cst {dimension_numbers = #tpu.dot_dimension_numbers<[1], [0], [0], [1], [0, 0, 1, 1], [], []>} : vector<128x256xbf16>, vector<256x128xbf16>, vector<128x128xf32> -> vector<128x128xf32>
    %c0_3 = arith.constant 0 : index
    %c0_4 = arith.constant 0 : index
    %3 = vector.load %arg3[%c0_3, %c0_4] : memref<1x128xf32, #tpu.memory_space<vmem>>, vector<1x128xf32>
    %4 = vector.broadcast %3 : vector<1x128xf32> to vector<128x128xf32>
    %5 = arith.addf %2, %4 : vector<128x128xf32>
    %cst_5 = arith.constant 0.000000e+00 : f32
    %6 = vector.broadcast %cst_5 : f32 to vector<128x128xf32>
    %7 = arith.maximumf %5, %6 : vector<128x128xf32>
    %8 = arith.truncf %7 : vector<128x128xf32> to vector<128x128xbf16>
    %c0_6 = arith.constant 0 : index
    %c0_7 = arith.constant 0 : index
    %9 = vector.load %arg4[%c0_6, %c0_7] : memref<128x128xbf16, #tpu.memory_space<vmem>>, vector<128x128xbf16>
    tpu.vector_store %arg4[%c0_6, %c0_7], %8 {strides = array<i32>} : memref<128x128xbf16, #tpu.memory_space<vmem>>, vector<128x128xbf16>,
    return
  }
  func.func @transform_0(%arg0: i32) -> (i32, i32) {
    %c0_i32 = arith.constant 0 : i32
    %c0_i32_0 = arith.constant 0 : i32
    return %arg0, %c0_i32 : i32, i32
  }
  func.func @transform_1(%arg0: i32) -> (i32, i32) {
    %c0_i32 = arith.constant 0 : i32
    %c0_i32_0 = arith.constant 0 : i32
    %c0_i32_1 = arith.constant 0 : i32
    return %c0_i32, %c0_i32_0 : i32, i32
  }
  func.func @transform_2(%arg0: i32) -> (i32, i32) {
    %c0_i32 = arith.constant 0 : i32
    %c0_i32_0 = arith.constant 0 : i32
    %c0_i32_1 = arith.constant 0 : i32
    return %c0_i32, %c0_i32_0 : i32, i32
  }
  func.func @transform_3(%arg0: i32) -> (i32, i32) {
    %c0_i32 = arith.constant 0 : i32
    %c0_i32_0 = arith.constant 0 : i32
    return %arg0, %c0_i32 : i32, i32
  }
}

module attributes {stable_mosaic.version = 11 : i64} {
  func.func @_matmul_bias_kernel(%arg0: i32, %arg1: memref<32x2048xbf16, #tpu.memory_space<vmem>>, %arg2: memref<2048x128xbf16, #tpu.memory_space<vmem>>, %arg3: memref<1x128xf32, #tpu.memory_space<vmem>>, %arg4: memref<32x128xbf16, #tpu.memory_space<vmem>>) attributes {dimension_semantics = [#tpu.dimension_semantics<parallel>], iteration_bounds = array<i64: 1>, scalar_prefetch = 0 : i64, scratch_operands = 0 : i64, tpu.core_type = #tpu.core_type<tc>, window_params = [{transform_indices = @transform_0, window_bounds = array<i64: 32, 2048>}, {pipeline_mode = #tpu.pipeline_mode<synchronous>, transform_indices = @transform_1, window_bounds = array<i64: 2048, 128>}, {pipeline_mode = #tpu.pipeline_mode<synchronous>, transform_indices = @transform_2, window_bounds = array<i64: 1, 128>}, {transform_indices = @transform_3, window_bounds = array<i64: 32, 128>}]} {
    %c0 = arith.constant 0 : index
    %c0_0 = arith.constant 0 : index
    %0 = vector.load %arg1[%c0, %c0_0] : memref<32x2048xbf16, #tpu.memory_space<vmem>>, vector<32x2048xbf16>
    %c0_1 = arith.constant 0 : index
    %c0_2 = arith.constant 0 : index
    %1 = vector.load %arg2[%c0_1, %c0_2] : memref<2048x128xbf16, #tpu.memory_space<vmem>>, vector<2048x128xbf16>
    %cst = arith.constant dense<0.000000e+00> : vector<32x128xf32>
    %2 = tpu.matmul %0, %1, %cst {dimension_numbers = #tpu.dot_dimension_numbers<[1], [0], [0], [1], [0, 0, 1, 1], [], []>} : vector<32x2048xbf16>, vector<2048x128xbf16>, vector<32x128xf32> -> vector<32x128xf32>
    %c0_3 = arith.constant 0 : index
    %c0_4 = arith.constant 0 : index
    %3 = vector.load %arg3[%c0_3, %c0_4] : memref<1x128xf32, #tpu.memory_space<vmem>>, vector<1x128xf32>
    %4 = vector.broadcast %3 : vector<1x128xf32> to vector<32x128xf32>
    %5 = arith.addf %2, %4 : vector<32x128xf32>
    %cst_5 = arith.constant 0.000000e+00 : f32
    %6 = vector.broadcast %cst_5 : f32 to vector<32x128xf32>
    %7 = arith.maximumf %5, %6 : vector<32x128xf32>
    %8 = arith.truncf %7 : vector<32x128xf32> to vector<32x128xbf16>
    %c0_6 = arith.constant 0 : index
    %c0_7 = arith.constant 0 : index
    %9 = vector.load %arg4[%c0_6, %c0_7] : memref<32x128xbf16, #tpu.memory_space<vmem>>, vector<32x128xbf16>
    tpu.vector_store %arg4[%c0_6, %c0_7], %8 {strides = array<i32>} : memref<32x128xbf16, #tpu.memory_space<vmem>>, vector<32x128xbf16>,
    return
  }
  func.func @transform_0(%arg0: i32) -> (i32, i32) {
    %c0_i32 = arith.constant 0 : i32
    %c0_i32_0 = arith.constant 0 : i32
    return %arg0, %c0_i32 : i32, i32
  }
  func.func @transform_1(%arg0: i32) -> (i32, i32) {
    %c0_i32 = arith.constant 0 : i32
    %c0_i32_0 = arith.constant 0 : i32
    %c0_i32_1 = arith.constant 0 : i32
    return %c0_i32, %c0_i32_0 : i32, i32
  }
  func.func @transform_2(%arg0: i32) -> (i32, i32) {
    %c0_i32 = arith.constant 0 : i32
    %c0_i32_0 = arith.constant 0 : i32
    %c0_i32_1 = arith.constant 0 : i32
    return %c0_i32, %c0_i32_0 : i32, i32
  }
  func.func @transform_3(%arg0: i32) -> (i32, i32) {
    %c0_i32 = arith.constant 0 : i32
    %c0_i32_0 = arith.constant 0 : i32
    return %arg0, %c0_i32 : i32, i32
  }
}

module attributes {stable_mosaic.version = 11 : i64} {
  func.func @_fused_fc_kernel(%arg0: i32, %arg1: memref<16x128xbf16, #tpu.memory_space<vmem>>, %arg2: memref<128x512xbf16, #tpu.memory_space<vmem>>, %arg3: memref<1x512xf32, #tpu.memory_space<vmem>>, %arg4: memref<512x128xbf16, #tpu.memory_space<vmem>>, %arg5: memref<1x128xf32, #tpu.memory_space<vmem>>, %arg6: memref<16x128xf32, #tpu.memory_space<vmem>>) attributes {dimension_semantics = [#tpu.dimension_semantics<parallel>], iteration_bounds = array<i64: 1>, scalar_prefetch = 0 : i64, scratch_operands = 0 : i64, tpu.core_type = #tpu.core_type<tc>, window_params = [{transform_indices = @transform_0, window_bounds = array<i64: 16, 128>}, {pipeline_mode = #tpu.pipeline_mode<synchronous>, transform_indices = @transform_1, window_bounds = array<i64: 128, 512>}, {pipeline_mode = #tpu.pipeline_mode<synchronous>, transform_indices = @transform_2, window_bounds = array<i64: 1, 512>}, {pipeline_mode = #tpu.pipeline_mode<synchronous>, transform_indices = @transform_3, window_bounds = array<i64: 512, 128>}, {pipeline_mode = #tpu.pipeline_mode<synchronous>, transform_indices = @transform_4, window_bounds = array<i64: 1, 128>}, {transform_indices = @transform_5, window_bounds = array<i64: 16, 128>}]} {
    %c0 = arith.constant 0 : index
    %c0_0 = arith.constant 0 : index
    %0 = vector.load %arg1[%c0, %c0_0] : memref<16x128xbf16, #tpu.memory_space<vmem>>, vector<16x128xbf16>
    %c0_1 = arith.constant 0 : index
    %c0_2 = arith.constant 0 : index
    %1 = vector.load %arg2[%c0_1, %c0_2] : memref<128x512xbf16, #tpu.memory_space<vmem>>, vector<128x512xbf16>
    %cst = arith.constant dense<0.000000e+00> : vector<16x512xf32>
    %2 = tpu.matmul %0, %1, %cst {dimension_numbers = #tpu.dot_dimension_numbers<[1], [0], [0], [1], [0, 0, 1, 1], [], []>} : vector<16x128xbf16>, vector<128x512xbf16>, vector<16x512xf32> -> vector<16x512xf32>
    %c0_3 = arith.constant 0 : index
    %c0_4 = arith.constant 0 : index
    %3 = vector.load %arg3[%c0_3, %c0_4] : memref<1x512xf32, #tpu.memory_space<vmem>>, vector<1x512xf32>
    %4 = vector.broadcast %3 : vector<1x512xf32> to vector<16x512xf32>
    %5 = arith.addf %2, %4 : vector<16x512xf32>
    %cst_5 = arith.constant 0.000000e+00 : f32
    %6 = vector.broadcast %cst_5 : f32 to vector<16x512xf32>
    %7 = arith.maximumf %5, %6 : vector<16x512xf32>
    %8 = arith.truncf %7 : vector<16x512xf32> to vector<16x512xbf16>
    %c0_6 = arith.constant 0 : index
    %c0_7 = arith.constant 0 : index
    %9 = vector.load %arg4[%c0_6, %c0_7] : memref<512x128xbf16, #tpu.memory_space<vmem>>, vector<512x128xbf16>
    %cst_8 = arith.constant dense<0.000000e+00> : vector<16x128xf32>
    %10 = tpu.matmul %8, %9, %cst_8 {dimension_numbers = #tpu.dot_dimension_numbers<[1], [0], [0], [1], [0, 0, 1, 1], [], []>} : vector<16x512xbf16>, vector<512x128xbf16>, vector<16x128xf32> -> vector<16x128xf32>
    %c0_9 = arith.constant 0 : index
    %c0_10 = arith.constant 0 : index
    %11 = vector.load %arg5[%c0_9, %c0_10] : memref<1x128xf32, #tpu.memory_space<vmem>>, vector<1x128xf32>
    %12 = vector.broadcast %11 : vector<1x128xf32> to vector<16x128xf32>
    %13 = arith.addf %10, %12 : vector<16x128xf32>
    %c0_11 = arith.constant 0 : index
    %c0_12 = arith.constant 0 : index
    %14 = vector.load %arg6[%c0_11, %c0_12] : memref<16x128xf32, #tpu.memory_space<vmem>>, vector<16x128xf32>
    tpu.vector_store %arg6[%c0_11, %c0_12], %13 {strides = array<i32>} : memref<16x128xf32, #tpu.memory_space<vmem>>, vector<16x128xf32>,
    return
  }
  func.func @transform_0(%arg0: i32) -> (i32, i32) {
    %c0_i32 = arith.constant 0 : i32
    %c0_i32_0 = arith.constant 0 : i32
    return %arg0, %c0_i32 : i32, i32
  }
  func.func @transform_1(%arg0: i32) -> (i32, i32) {
    %c0_i32 = arith.constant 0 : i32
    %c0_i32_0 = arith.constant 0 : i32
    %c0_i32_1 = arith.constant 0 : i32
    return %c0_i32, %c0_i32_0 : i32, i32
  }
  func.func @transform_2(%arg0: i32) -> (i32, i32) {
    %c0_i32 = arith.constant 0 : i32
    %c0_i32_0 = arith.constant 0 : i32
    %c0_i32_1 = arith.constant 0 : i32
    return %c0_i32, %c0_i32_0 : i32, i32
  }
  func.func @transform_3(%arg0: i32) -> (i32, i32) {
    %c0_i32 = arith.constant 0 : i32
    %c0_i32_0 = arith.constant 0 : i32
    %c0_i32_1 = arith.constant 0 : i32
    return %c0_i32, %c0_i32_0 : i32, i32
  }
  func.func @transform_4(%arg0: i32) -> (i32, i32) {
    %c0_i32 = arith.constant 0 : i32
    %c0_i32_0 = arith.constant 0 : i32
    %c0_i32_1 = arith.constant 0 : i32
    return %c0_i32, %c0_i32_0 : i32, i32
  }
  func.func @transform_5(%arg0: i32) -> (i32, i32) {
    %c0_i32 = arith.constant 0 : i32
    %c0_i32_0 = arith.constant 0 : i32
    return %arg0, %c0_i32 : i32, i32
  }
}

module attributes {stable_mosaic.version = 11 : i64} {
  func.func @_matmul_bias_kernel(%arg0: i32, %arg1: memref<16x1152xbf16, #tpu.memory_space<vmem>>, %arg2: memref<1152x128xbf16, #tpu.memory_space<vmem>>, %arg3: memref<1x128xf32, #tpu.memory_space<vmem>>, %arg4: memref<16x128xbf16, #tpu.memory_space<vmem>>) attributes {dimension_semantics = [#tpu.dimension_semantics<parallel>], iteration_bounds = array<i64: 1>, scalar_prefetch = 0 : i64, scratch_operands = 0 : i64, tpu.core_type = #tpu.core_type<tc>, window_params = [{transform_indices = @transform_0, window_bounds = array<i64: 16, 1152>}, {pipeline_mode = #tpu.pipeline_mode<synchronous>, transform_indices = @transform_1, window_bounds = array<i64: 1152, 128>}, {pipeline_mode = #tpu.pipeline_mode<synchronous>, transform_indices = @transform_2, window_bounds = array<i64: 1, 128>}, {transform_indices = @transform_3, window_bounds = array<i64: 16, 128>}]} {
    %c0 = arith.constant 0 : index
    %c0_0 = arith.constant 0 : index
    %0 = vector.load %arg1[%c0, %c0_0] : memref<16x1152xbf16, #tpu.memory_space<vmem>>, vector<16x1152xbf16>
    %c0_1 = arith.constant 0 : index
    %c0_2 = arith.constant 0 : index
    %1 = vector.load %arg2[%c0_1, %c0_2] : memref<1152x128xbf16, #tpu.memory_space<vmem>>, vector<1152x128xbf16>
    %cst = arith.constant dense<0.000000e+00> : vector<16x128xf32>
    %2 = tpu.matmul %0, %1, %cst {dimension_numbers = #tpu.dot_dimension_numbers<[1], [0], [0], [1], [0, 0, 1, 1], [], []>} : vector<16x1152xbf16>, vector<1152x128xbf16>, vector<16x128xf32> -> vector<16x128xf32>
    %c0_3 = arith.constant 0 : index
    %c0_4 = arith.constant 0 : index
    %3 = vector.load %arg3[%c0_3, %c0_4] : memref<1x128xf32, #tpu.memory_space<vmem>>, vector<1x128xf32>
    %4 = vector.broadcast %3 : vector<1x128xf32> to vector<16x128xf32>
    %5 = arith.addf %2, %4 : vector<16x128xf32>
    %cst_5 = arith.constant 0.000000e+00 : f32
    %6 = vector.broadcast %cst_5 : f32 to vector<16x128xf32>
    %7 = arith.maximumf %5, %6 : vector<16x128xf32>
    %8 = arith.truncf %7 : vector<16x128xf32> to vector<16x128xbf16>
    %c0_6 = arith.constant 0 : index
    %c0_7 = arith.constant 0 : index
    %9 = vector.load %arg4[%c0_6, %c0_7] : memref<16x128xbf16, #tpu.memory_space<vmem>>, vector<16x128xbf16>
    tpu.vector_store %arg4[%c0_6, %c0_7], %8 {strides = array<i32>} : memref<16x128xbf16, #tpu.memory_space<vmem>>, vector<16x128xbf16>,
    return
  }
  func.func @transform_0(%arg0: i32) -> (i32, i32) {
    %c0_i32 = arith.constant 0 : i32
    %c0_i32_0 = arith.constant 0 : i32
    return %arg0, %c0_i32 : i32, i32
  }
  func.func @transform_1(%arg0: i32) -> (i32, i32) {
    %c0_i32 = arith.constant 0 : i32
    %c0_i32_0 = arith.constant 0 : i32
    %c0_i32_1 = arith.constant 0 : i32
    return %c0_i32, %c0_i32_0 : i32, i32
  }
  func.func @transform_2(%arg0: i32) -> (i32, i32) {
    %c0_i32 = arith.constant 0 : i32
    %c0_i32_0 = arith.constant 0 : i32
    %c0_i32_1 = arith.constant 0 : i32
    return %c0_i32, %c0_i32_0 : i32, i32
  }
  func.func @transform_3(%arg0: i32) -> (i32, i32) {
    %c0_i32 = arith.constant 0 : i32
    %c0_i32_0 = arith.constant 0 : i32
    return %arg0, %c0_i32 : i32, i32
  }
}

</mosaic_0001>

<bundles_post_ra>
// kernel: dqn_forward.4
= control target key start
LH: loop header
LB: loop body
LE: loop exit
PB: predicated region body
PF: predicated region fallthrough
CT: control target
= control target key end

     0   :  { %s836_s1 = inlined_call_operand.vmem [shape: bf16[256,128], index: 1, kind: input, shape index: {}]   ;;  %s837_s0 = inlined_call_operand.vmem [shape: bf16[128,256], index: 0, kind: input, shape index: {}]   ;;  %s838_s2 = inlined_call_operand.vmem [shape: f32[1,128], index: 2, kind: input, shape index: {}]   ;;  %s839_s3 = inlined_call_operand.vmem [shape: bf16[128,128], index: 3, kind: output, shape index: {}]  }
   0x1   :  { %v635_v0 = vld [vmem:[%s836_s1 + $0x40] sm:$0xff]   ;;  %v637_v2 = vld [vmem:[%s836_s1 + $0x48] sm:$0xff]   ;;  %v639_v4 = vld [vmem:[%s836_s1 + $0x50] sm:$0xff]  }
   0x2   :  { %v636_v1 = vld [vmem:[%s836_s1] sm:$0xff]   ;;  %555 = vmatprep.subr.bf16.mxu0 %v635_v0  ;;  %619 = vmatprep.subr.bf16.mxu1 %v635_v0  ;;  %v638_v3 = vld [vmem:[%s836_s1 + $0x8] sm:$0xff]   ;;  %v640_v5 = vld [vmem:[%s836_s1 + $0x10] sm:$0xff]  }
   0x3   :  { %556 = vmatpush3.bf16.msra.mxu0 %v636_v1  ;;  %627 = vmatpush3.bf16.msra.mxu1 %v636_v1  ;;  %v641_v6 = vld [vmem:[%s836_s1 + $0x58] sm:$0xff]   ;;  %v643_v8 = vld [vmem:[%s836_s1 + $0x60] sm:$0xff]   ;;  %v645_v10 = vld [vmem:[%s836_s1 + $0x68] sm:$0xff]  }
   0x4   :  { %557 = vmatprep.subr.bf16.mxu0 %v637_v2  ;;  %620 = vmatprep.subr.bf16.mxu1 %v637_v2  ;;  %v642_v7 = vld [vmem:[%s836_s1 + $0x18] sm:$0xff]   ;;  %v644_v9 = vld [vmem:[%s836_s1 + $0x20] sm:$0xff]   ;;  %v646_v13 = vld [vmem:[%s836_s1 + $0x28] sm:$0xff]  }
   0x5   :  { %v653_v11 = vld [vmem:[%s837_s0 + $0x4] ss:$8 sps:$4 sm:$0xff]   ;;  %v647_v14 = vld [vmem:[%s836_s1 + $0x70] sm:$0xff]   ;;  %v649_v16 = vld [vmem:[%s836_s1 + $0x78] sm:$0xff]  }
   0x6   :  { %v656_v12 = vld [vmem:[%s837_s0 + $0x44] ss:$8 sps:$4 sm:$0xff]   ;;  %278 = vmatprep.mubr.bf16.mxu0 %v653_v11  ;;  %v648_v15 = vld [vmem:[%s836_s1 + $0x30] sm:$0xff]   ;;  %v650_v17 = vld [vmem:[%s836_s1 + $0x38] sm:$0xff]  }
   0x7   :  { %558 = vmatpush3.bf16.msra.mxu0 %v638_v3  ;;  %628 = vmatpush3.bf16.msra.mxu1 %v638_v3  ;;  %v651_v18 = vld [vmem:[%s837_s0] ss:$8 sps:$4 sm:$0xff]   ;;  %v657_v20 = vld [vmem:[%s837_s0 + $0x14] ss:$8 sps:$4 sm:$0xff]   ;;  %v661_v22 = vld [vmem:[%s837_s0 + $0x10] ss:$8 sps:$4 sm:$0xff]  }
   0x8   :  { %559 = vmatprep.subr.bf16.mxu0 %v639_v4  ;;  %621 = vmatprep.subr.bf16.mxu1 %v639_v4  ;;  %v654_v19 = vld [vmem:[%s837_s0 + $0x40] ss:$8 sps:$4 sm:$0xff]   ;;  %v659_v21 = vld [vmem:[%s837_s0 + $0x54] ss:$8 sps:$4 sm:$0xff]   ;;  %v662_v23 = vld [vmem:[%s837_s0 + $0x50] ss:$8 sps:$4 sm:$0xff]  }
   0x9   :  { %310 = vmatprep.mubr.bf16.mxu1 %v656_v12  ;;  %v663_v24 = vld [vmem:[%s837_s0 + $0x24] ss:$8 sps:$4 sm:$0xff]   ;;  %v667_v26 = vld [vmem:[%s837_s0 + $0x20] ss:$8 sps:$4 sm:$0xff]   ;;  %v669_v28 = vld [vmem:[%s837_s0 + $0x34] ss:$8 sps:$4 sm:$0xff]  }
   0xa   :  { %v665_v25 = vld [vmem:[%s837_s0 + $0x64] ss:$8 sps:$4 sm:$0xff]   ;;  %v668_v27 = vld [vmem:[%s837_s0 + $0x60] ss:$8 sps:$4 sm:$0xff]   ;;  %v671_v29 = vld [vmem:[%s837_s0 + $0x74] ss:$8 sps:$4 sm:$0xff]  }
   0xb   :  { %560 = vmatpush3.bf16.msra.mxu0 %v640_v5  ;;  %629 = vmatpush3.bf16.msra.mxu1 %v640_v5  ;;  %v673_v30 = vld [vmem:[%s837_s0 + $0x30] ss:$8 sps:$4 sm:$0xff]   ;;  %v794_v34 = vld [vmem:[%s838_s2] ss:$0 sm:$0xff] }
   0xc   :  { %561 = vmatprep.subr.bf16.mxu0 %v641_v6  ;;  %622 = vmatprep.subr.bf16.mxu1 %v641_v6  ;;  %v674_v31 = vld [vmem:[%s837_s0 + $0x70] ss:$8 sps:$4 sm:$0xff]  }
   0xf   :  { %562 = vmatpush3.bf16.msra.mxu0 %v642_v7  ;;  %630 = vmatpush3.bf16.msra.mxu1 %v642_v7 }
  0x10   :  { %563 = vmatprep.subr.bf16.mxu0 %v643_v8  ;;  %623 = vmatprep.subr.bf16.mxu1 %v643_v8 }
  0x13   :  { %564 = vmatpush3.bf16.msra.mxu0 %v644_v9  ;;  %631 = vmatpush3.bf16.msra.mxu1 %v644_v9 }
  0x14   :  { %565 = vmatprep.subr.bf16.mxu0 %v645_v10  ;;  %624 = vmatprep.subr.bf16.mxu1 %v645_v10 }
  0x17   :  { %566 = vmatpush3.bf16.msra.mxu0 %v646_v13  ;;  %632 = vmatpush3.bf16.msra.mxu1 %v646_v13 }
  0x18   :  { %567 = vmatprep.subr.bf16.mxu0 %v647_v14  ;;  %625 = vmatprep.subr.bf16.mxu1 %v647_v14 }
  0x1b   :  { %568 = vmatpush3.bf16.msra.mxu0 %v648_v15  ;;  %633 = vmatpush3.bf16.msra.mxu1 %v648_v15 }
  0x1c   :  { %569 = vmatprep.subr.bf16.mxu0 %v649_v16  ;;  %626 = vmatprep.subr.bf16.mxu1 %v649_v16 }
  0x1f   :  { %570 = vmatpush3.bf16.msra.mxu0 %v650_v17  ;;  %634 = vmatpush3.bf16.msra.mxu1 %v650_v17 }
  0x22   :  { %279 = vmatmul.mubr.bf16.vlgmr.msra.gmra.mrb[0].mxu0 %v651_v18  ;;  %311 = vmatmul.mubr.bf16.vlgmr.msra.gmra.mrb[0].mxu1 %v654_v19 }
  0x23   :  { %286 = vmatprep.mubr.bf16.mxu0 %v657_v20  ;;  %318 = vmatprep.mubr.bf16.mxu1 %v659_v21 }
  0x2a   :  { %287 = vmatmul.mubr.bf16.gmra.mrb[4].mxu0 %v661_v22  ;;  %319 = vmatmul.mubr.bf16.gmra.mrb[4].mxu1 %v662_v23 }
  0x2b   :  { %294 = vmatprep.mubr.bf16.mxu0 %v663_v24  ;;  %326 = vmatprep.mubr.bf16.mxu1 %v665_v25 }
  0x32   :  { %295 = vmatmul.mubr.bf16.gmra.mrb[8].mxu0 %v667_v26  ;;  %327 = vmatmul.mubr.bf16.gmra.mrb[8].mxu1 %v668_v27 }
  0x33   :  { %302 = vmatprep.mubr.bf16.mxu0 %v669_v28  ;;  %334 = vmatprep.mubr.bf16.mxu1 %v671_v29 }
  0x3a   :  { %303 = vmatmul.mubr.bf16.gmra.mrb[12].mxu0 %v673_v30  ;;  %335 = vmatmul.mubr.bf16.gmra.mrb[12].mxu1 %v674_v31 }
  0xf5   :  { %v571_v32 = vpop.f32.mrb[0].mxu0  ;;  %v595_v33 = vpop.f32.mrb[0].mxu1 }
  0xf6   :  { %v572_v35 = vpop.f32.mrb[1].mxu0  ;;  %v596_v36 = vpop.f32.mrb[1].mxu1 }
  0xf7   :  { %v573_v37 = vadd.f32 %v572_v35, %v571_v32  ;;  %v597_v38 = vadd.f32 %v596_v36, %v595_v33  ;;  %v574_v39 = vpop.f32.mrb[2].mxu0  ;;  %v598_v40 = vpop.f32.mrb[2].mxu1 }
  0xf8   :  { %v575_v41 = vpop.f32.mrb[3].mxu0  ;;  %v599_v42 = vpop.f32.mrb[3].mxu1 }
  0xf9   :  { %v281_v43 = vadd.f32 %v573_v37, %v794_v34  ;;  %v313_v44 = vadd.f32 %v597_v38, %v794_v34  ;;  %v576_v45 = vadd.f32 %v575_v41, %v574_v39  ;;  %v600_v46 = vadd.f32 %v599_v42, %v598_v40 }
  0xfb   :  { %v284_v47 = vadd.f32 %v576_v45, %v794_v34  ;;  %v316_v48 = vadd.f32 %v600_v46, %v794_v34  ;;  %v343_v49 = vmax.f32 %v281_v43, 0.0  ;;  %v351_v50 = vmax.f32 %v313_v44, 0.0 }
  0xfd   :  { %v344_v51 = vmax.f32 %v284_v47, 0.0  ;;  %v352_v52 = vmax.f32 %v316_v48, 0.0  ;;  %v577_v53 = vpop.f32.mrb[4].mxu0  ;;  %v601_v54 = vpop.f32.mrb[4].mxu1 }
  0xfe   :  { %v578_v55 = vpop.f32.mrb[5].mxu0  ;;  %v602_v56 = vpop.f32.mrb[5].mxu1 }
  0xff   :  { %v511_v57 = vpack.c.bf16 %v344_v51, %v343_v49  ;;  %v531_v58 = vpack.c.bf16 %v352_v52, %v351_v50  ;;  %v579_v59 = vadd.f32 %v578_v55, %v577_v53  ;;  %v603_v60 = vadd.f32 %v602_v56, %v601_v54  ;;  %v580_v61 = vpop.f32.mrb[6].mxu0  ;;  %v604_v62 = vpop.f32.mrb[6].mxu1 }
 0x100   :  { %v581_v63 = vpop.f32.mrb[7].mxu0  ;;  %v605_v0 = vpop.f32.mrb[7].mxu1 }
 0x101   :  { %512 = vst [vmem:[%s839_s3] sm:$0xff] %v511_v57   ;;  %551 = vst [vmem:[%s839_s3 + $0x20] sm:$0xff] %v531_v58   ;;  %v289_v1 = vadd.f32 %v579_v59, %v794_v34  ;;  %v321_v2 = vadd.f32 %v603_v60, %v794_v34  ;;  %v582_v3 = vadd.f32 %v581_v63, %v580_v61 }
 0x102   :  { %v606_v4 = vadd.f32 %v605_v0, %v604_v62 }
 0x103   :  { %v292_v5 = vadd.f32 %v582_v3, %v794_v34  ;;  %v345_v7 = vmax.f32 %v289_v1, 0.0  ;;  %v353_v8 = vmax.f32 %v321_v2, 0.0 }
 0x104   :  { %v324_v6 = vadd.f32 %v606_v4, %v794_v34 }
 0x105   :  { %v346_v9 = vmax.f32 %v292_v5, 0.0  ;;  %v583_v11 = vpop.f32.mrb[8].mxu0  ;;  %v607_v12 = vpop.f32.mrb[8].mxu1 }
 0x106   :  { %v354_v10 = vmax.f32 %v324_v6, 0.0  ;;  %v584_v13 = vpop.f32.mrb[9].mxu0  ;;  %v608_v14 = vpop.f32.mrb[9].mxu1 }
 0x107   :  { %v516_v15 = vpack.c.bf16 %v346_v9, %v345_v7  ;;  %v585_v17 = vadd.f32 %v584_v13, %v583_v11  ;;  %v609_v18 = vadd.f32 %v608_v14, %v607_v12  ;;  %v586_v19 = vpop.f32.mrb[10].mxu0  ;;  %v610_v20 = vpop.f32.mrb[10].mxu1 }
 0x108   :  { %v536_v16 = vpack.c.bf16 %v354_v10, %v353_v8  ;;  %v587_v21 = vpop.f32.mrb[11].mxu0  ;;  %v611_v22 = vpop.f32.mrb[11].mxu1 }
 0x109   :  { %548 = vst [vmem:[%s839_s3 + $0x8] sm:$0xff] %v516_v15   ;;  %v297_v23 = vadd.f32 %v585_v17, %v794_v34  ;;  %v329_v24 = vadd.f32 %v609_v18, %v794_v34  ;;  %v588_v25 = vadd.f32 %v587_v21, %v586_v19  ;;  %v612_v26 = vadd.f32 %v611_v22, %v610_v20 }
 0x10a   :  { %552 = vst [vmem:[%s839_s3 + $0x28] sm:$0xff] %v536_v16  }
 0x10b   :  { %v300_v27 = vadd.f32 %v588_v25, %v794_v34  ;;  %v332_v28 = vadd.f32 %v612_v26, %v794_v34  ;;  %v347_v29 = vmax.f32 %v297_v23, 0.0  ;;  %v355_v30 = vmax.f32 %v329_v24, 0.0 }
 0x10d   :  { %v348_v31 = vmax.f32 %v300_v27, 0.0  ;;  %v356_v32 = vmax.f32 %v332_v28, 0.0  ;;  %v589_v33 = vpop.f32.mrb[12].mxu0  ;;  %v613_v35 = vpop.f32.mrb[12].mxu1 }
 0x10e   :  { %v590_v36 = vpop.f32.mrb[13].mxu0  ;;  %v614_v37 = vpop.f32.mrb[13].mxu1 }
 0x10f   :  { %v521_v38 = vpack.c.bf16 %v348_v31, %v347_v29  ;;  %v541_v39 = vpack.c.bf16 %v356_v32, %v355_v30  ;;  %v591_v40 = vadd.f32 %v590_v36, %v589_v33  ;;  %v615_v41 = vadd.f32 %v614_v37, %v613_v35  ;;  %v592_v42 = vpop.f32.mrb[14].mxu0  ;;  %v616_v43 = vpop.f32.mrb[14].mxu1 }
 0x110   :  { %v593_v44 = vpop.f32.mrb[15].mxu0  ;;  %v617_v45 = vpop.f32.mrb[15].mxu1 }
 0x111   :  { %549 = vst [vmem:[%s839_s3 + $0x10] sm:$0xff] %v521_v38   ;;  %553 = vst [vmem:[%s839_s3 + $0x30] sm:$0xff] %v541_v39   ;;  %v305_v46 = vadd.f32 %v591_v40, %v794_v34  ;;  %v337_v47 = vadd.f32 %v615_v41, %v794_v34  ;;  %v594_v48 = vadd.f32 %v593_v44, %v592_v42 }
 0x112   :  { %v618_v49 = vadd.f32 %v617_v45, %v616_v43 }
 0x113   :  { %v308_v50 = vadd.f32 %v594_v48, %v794_v34  ;;  %v349_v52 = vmax.f32 %v305_v46, 0.0  ;;  %v357_v53 = vmax.f32 %v337_v47, 0.0 }
 0x114   :  { %v340_v51 = vadd.f32 %v618_v49, %v794_v34 }
 0x115   :  { %v350_v54 = vmax.f32 %v308_v50, 0.0 }
 0x116   :  { %v358_v55 = vmax.f32 %v340_v51, 0.0 }
 0x117   :  { %v526_v56 = vpack.c.bf16 %v350_v54, %v349_v52 }
 0x118   :  { %v546_v57 = vpack.c.bf16 %v358_v55, %v357_v53 }
 0x119   :  { %550 = vst [vmem:[%s839_s3 + $0x18] sm:$0xff] %v526_v56  }
 0x11a   :  { %554 = vst [vmem:[%s839_s3 + $0x38] sm:$0xff] %v546_v57  }

// kernel: dqn_forward.7
= control target key start
LH: loop header
LB: loop body
LE: loop exit
PB: predicated region body
PF: predicated region fallthrough
CT: control target
= control target key end

     0   :  { %v884_v1 = vmov 0   ;;  %s1122_s1 = inlined_call_operand.vmem [shape: bf16[128,512], index: 1, kind: input, shape index: {}]   ;;  %s1123_s0 = inlined_call_operand.vmem [shape: bf16[16,128], index: 0, kind: input, shape index: {}]   ;;  %s1124_s3 = inlined_call_operand.vmem [shape: bf16[512,128], index: 3, kind: input, shape index: {}]   ;;  %s1125_s2 = inlined_call_operand.vmem [shape: f32[1,512], index: 2, kind: input, shape index: {}]   ;;  %s1126_s4 = inlined_call_operand.vmem [shape: f32[1,128], index: 4, kind: input, shape index: {}]   ;;  %s1127_s5 = inlined_call_operand.vmem [shape: f32[16,128], index: 5, kind: output, shape index: {}]  }
   0x1   :  { %v803_v0 = vld [vmem:[%s1122_s1 + $0x4] ss:$16 sps:$4 sm:$0xff]   ;;  %275 = vmatprep.mubr.bf16.mxu0 %v884_v1  ;;  %318 = vmatprep.mubr.bf16.mxu1 %v884_v1  ;;  %v805_v2 = vld [vmem:[%s1122_s1 + $0xc] ss:$16 sps:$4 sm:$0xff]   ;;  %v807_v3 = vld [vmem:[%s1122_s1] ss:$16 sps:$4 sm:$0xff]  }
   0x2   :  { %243 = vmatprep.subr.bf16.mxu0 %v803_v0  ;;  %v808_v4 = vld [vmem:[%s1122_s1 + $0x8] ss:$16 sps:$4 sm:$0xff]   ;;  %286 = vmatprep.subr.bf16.mxu1 %v805_v2  ;;  %v809_v5 = vld [vmem:[%s1122_s1 + $0x24] ss:$16 sps:$4 sm:$0xff]   ;;  %v811_v6 = vld [vmem:[%s1122_s1 + $0x2c] ss:$16 sps:$4 sm:$0xff]   ;;  %v57_v2 = vlaneseq }
   0x3   :  { %244 = vmatpush1.bf16.msra.mxu0 %v807_v3  ;;  %287 = vmatpush1.bf16.msra.mxu1 %v808_v4  ;;  %v813_v7 = vld [vmem:[%s1122_s1 + $0x20] ss:$16 sps:$4 sm:$0xff]   ;;  %v814_v8 = vld [vmem:[%s1122_s1 + $0x28] ss:$16 sps:$4 sm:$0xff]   ;;  %v815_v9 = vld [vmem:[%s1122_s1 + $0x44] ss:$16 sps:$4 sm:$0xff]  }
   0x4   :  { %245 = vmatprep.subr.bf16.mxu0 %v809_v5  ;;  %288 = vmatprep.subr.bf16.mxu1 %v811_v6  ;;  %v817_v10 = vld [vmem:[%s1122_s1 + $0x4c] ss:$16 sps:$4 sm:$0xff]   ;;  %v819_v11 = vld [vmem:[%s1122_s1 + $0x40] ss:$16 sps:$4 sm:$0xff]   ;;  %v820_v12 = vld [vmem:[%s1122_s1 + $0x48] ss:$16 sps:$4 sm:$0xff]  }
   0x5   :  { %v821_v13 = vld [vmem:[%s1122_s1 + $0x64] ss:$16 sps:$4 sm:$0xff]   ;;  %v823_v14 = vld [vmem:[%s1122_s1 + $0x6c] ss:$16 sps:$4 sm:$0xff]   ;;  %v825_v15 = vld [vmem:[%s1122_s1 + $0x60] ss:$16 sps:$4 sm:$0xff]  }
   0x6   :  { %v826_v16 = vld [vmem:[%s1122_s1 + $0x68] ss:$16 sps:$4 sm:$0xff]   ;;  %v827_v17 = vld [vmem:[%s1122_s1 + $0x84] ss:$16 sps:$4 sm:$0xff]   ;;  %v829_v18 = vld [vmem:[%s1122_s1 + $0x8c] ss:$16 sps:$4 sm:$0xff]  }
   0x7   :  { %246 = vmatpush1.bf16.msra.mxu0 %v813_v7  ;;  %289 = vmatpush1.bf16.msra.mxu1 %v814_v8  ;;  %v831_v19 = vld [vmem:[%s1122_s1 + $0x80] ss:$16 sps:$4 sm:$0xff]   ;;  %v832_v20 = vld [vmem:[%s1122_s1 + $0x88] ss:$16 sps:$4 sm:$0xff]   ;;  %v833_v21 = vld [vmem:[%s1122_s1 + $0xa4] ss:$16 sps:$4 sm:$0xff]  }
   0x8   :  { %247 = vmatprep.subr.bf16.mxu0 %v815_v9  ;;  %290 = vmatprep.subr.bf16.mxu1 %v817_v10  ;;  %v835_v22 = vld [vmem:[%s1122_s1 + $0xac] ss:$16 sps:$4 sm:$0xff]   ;;  %v837_v23 = vld [vmem:[%s1122_s1 + $0xa0] ss:$16 sps:$4 sm:$0xff]   ;;  %v838_v24 = vld [vmem:[%s1122_s1 + $0xa8] ss:$16 sps:$4 sm:$0xff]  }
   0x9   :  { %v839_v25 = vld [vmem:[%s1122_s1 + $0xc4] ss:$16 sps:$4 sm:$0xff]   ;;  %v841_v26 = vld [vmem:[%s1122_s1 + $0xcc] ss:$16 sps:$4 sm:$0xff]   ;;  %v843_v27 = vld [vmem:[%s1122_s1 + $0xc0] ss:$16 sps:$4 sm:$0xff]  }
   0xa   :  { %v844_v28 = vld [vmem:[%s1122_s1 + $0xc8] ss:$16 sps:$4 sm:$0xff]   ;;  %v845_v29 = vld [vmem:[%s1122_s1 + $0xe4] ss:$16 sps:$4 sm:$0xff]   ;;  %v847_v30 = vld [vmem:[%s1122_s1 + $0xec] ss:$16 sps:$4 sm:$0xff]  }
   0xb   :  { %248 = vmatpush1.bf16.msra.mxu0 %v819_v11  ;;  %291 = vmatpush1.bf16.msra.mxu1 %v820_v12  ;;  %v849_v31 = vld [vmem:[%s1122_s1 + $0xe0] ss:$16 sps:$4 sm:$0xff]   ;;  %v850_v32 = vld [vmem:[%s1122_s1 + $0xe8] ss:$16 sps:$4 sm:$0xff]   ;;  %v58_v3 = vshrl.u32 %v57_v2, 7 }
   0xc   :  { %249 = vmatprep.subr.bf16.mxu0 %v821_v13  ;;  %292 = vmatprep.subr.bf16.mxu1 %v823_v14  ;;  %v852_v33 = vld [vmem:[%s1124_s3 + $0x40] sm:$0xff]   ;;  %v856_v38 = vld [vmem:[%s1124_s3 + $0x48] sm:$0xff]   ;;  %v860_v42 = vld [vmem:[%s1124_s3 + $0x50] sm:$0xff]  }
   0xd   :  { %v851_v34 = vld [vmem:[%s1123_s0] sm:$0xff]   ;;  %v857_v39 = vld [vmem:[%s1124_s3 + $0xc8] sm:$0xff]   ;;  %v861_v43 = vld [vmem:[%s1124_s3 + $0xd0] sm:$0xff]   ;;  %v59_v4 = vsub.s32 0, %v58_v3  ;;  %v67_v5 = vsub.s32 2, %v58_v3  ;;  %v63_v7 = vsub.s32 1, %v58_v3 }
   0xe   :  { %v853_v35 = vld [vmem:[%s1124_s3 + $0xc0] sm:$0xff]   ;;  %v858_v40 = vld [vmem:[%s1124_s3 + $0x8] sm:$0xff]   ;;  %v862_v44 = vld [vmem:[%s1124_s3 + $0x10] sm:$0xff]   ;;  %v71_v8 = vsub.s32 3, %v58_v3 }
   0xf   :  { %250 = vmatpush1.bf16.msra.mxu0 %v825_v15  ;;  %293 = vmatpush1.bf16.msra.mxu1 %v826_v16  ;;  %v854_v36 = vld [vmem:[%s1124_s3] sm:$0xff]   ;;  %v859_v41 = vld [vmem:[%s1124_s3 + $0x88] sm:$0xff]   ;;  %v863_v45 = vld [vmem:[%s1124_s3 + $0x90] sm:$0xff]  }
  0x10   :  { %251 = vmatprep.subr.bf16.mxu0 %v827_v17  ;;  %294 = vmatprep.subr.bf16.mxu1 %v829_v18  ;;  %v855_v37 = vld [vmem:[%s1124_s3 + $0x80] sm:$0xff]   ;;  %v864_v46 = vld [vmem:[%s1124_s3 + $0x58] sm:$0xff]   ;;  %v872_v54 = vld [vmem:[%s1124_s3 + $0x68] sm:$0xff]  }
  0x11   :  { %v865_v47 = vld [vmem:[%s1124_s3 + $0xd8] sm:$0xff]   ;;  %v868_v50 = vld [vmem:[%s1124_s3 + $0x60] sm:$0xff]   ;;  %v873_v55 = vld [vmem:[%s1124_s3 + $0xe8] sm:$0xff]  }
  0x12   :  { %v866_v48 = vld [vmem:[%s1124_s3 + $0x18] sm:$0xff]   ;;  %v869_v51 = vld [vmem:[%s1124_s3 + $0xe0] sm:$0xff]   ;;  %v874_v56 = vld [vmem:[%s1124_s3 + $0x28] sm:$0xff]  }
  0x13   :  { %252 = vmatpush1.bf16.msra.mxu0 %v831_v19  ;;  %295 = vmatpush1.bf16.msra.mxu1 %v832_v20  ;;  %v867_v49 = vld [vmem:[%s1124_s3 + $0x98] sm:$0xff]   ;;  %v870_v52 = vld [vmem:[%s1124_s3 + $0x20] sm:$0xff]   ;;  %v875_v57 = vld [vmem:[%s1124_s3 + $0xa8] sm:$0xff]  }
  0x14   :  { %253 = vmatprep.subr.bf16.mxu0 %v833_v21  ;;  %296 = vmatprep.subr.bf16.mxu1 %v835_v22  ;;  %v871_v53 = vld [vmem:[%s1124_s3 + $0xa0] sm:$0xff]   ;;  %v876_v58 = vld [vmem:[%s1124_s3 + $0x70] sm:$0xff]   ;;  %v880_v62 = vld [vmem:[%s1124_s3 + $0x78] sm:$0xff]  }
  0x15   :  { %v877_v59 = vld [vmem:[%s1124_s3 + $0xf0] sm:$0xff]   ;;  %v881_v63 = vld [vmem:[%s1124_s3 + $0xf8] sm:$0xff]   ;;  %v55_v6 = vld [vmem:[%s1125_s2] sm:$0xf] }
  0x16   :  { %v878_v60 = vld [vmem:[%s1124_s3 + $0x30] sm:$0xff]   ;;  %v882_v0 = vld [vmem:[%s1124_s3 + $0x38] sm:$0xff]   ;;  %v60_v9 = vrot.slane %v55_v6, %v59_v4  ;;  %v68_v10 = vrot.slane %v55_v6, %v67_v5  ;;  %v64_v11 = vrot.slane %v55_v6, %v63_v7  ;;  %v72_v12 = vrot.slane %v55_v6, %v71_v8 }
  0x17   :  { %254 = vmatpush1.bf16.msra.mxu0 %v837_v23  ;;  %297 = vmatpush1.bf16.msra.mxu1 %v838_v24  ;;  %v879_v61 = vld [vmem:[%s1124_s3 + $0xb0] sm:$0xff]   ;;  %v883_v1 = vld [vmem:[%s1124_s3 + $0xb8] sm:$0xff]  }
  0x18   :  { %255 = vmatprep.subr.bf16.mxu0 %v839_v25  ;;  %298 = vmatprep.subr.bf16.mxu1 %v841_v26 }
  0x1b   :  { %256 = vmatpush1.bf16.msra.mxu0 %v843_v27  ;;  %299 = vmatpush1.bf16.msra.mxu1 %v844_v28 }
  0x1c   :  { %257 = vmatprep.subr.bf16.mxu0 %v845_v29  ;;  %300 = vmatprep.subr.bf16.mxu1 %v847_v30 }
  0x1f   :  { %258 = vmatpush1.bf16.msra.mxu0 %v849_v31  ;;  %301 = vmatpush1.bf16.msra.mxu1 %v850_v32 }
  0x20   :  { %758 = vmatprep.subr.bf16.mxu0 %v852_v33  ;;  %780 = vmatprep.subr.bf16.mxu1 %v853_v35 }
  0x22   :  { %276 = vmatmul.mubr.bf16.vlgmr.msra.gmra.mrb[0].mxu0 %v851_v34  ;;  %319 = vmatmul.mubr.bf16.vlgmr.msra.gmra.mrb[0].mxu1 %v851_v34 }
  0x23   :  { %759 = vmatpush3.bf16.msra.mxu0 %v854_v36  ;;  %781 = vmatpush3.bf16.msra.mxu1 %v855_v37 }
  0x24   :  { %760 = vmatprep.subr.bf16.mxu0 %v856_v38  ;;  %782 = vmatprep.subr.bf16.mxu1 %v857_v39 }
  0x27   :  { %761 = vmatpush3.bf16.msra.mxu0 %v858_v40  ;;  %783 = vmatpush3.bf16.msra.mxu1 %v859_v41 }
  0x28   :  { %762 = vmatprep.subr.bf16.mxu0 %v860_v42  ;;  %784 = vmatprep.subr.bf16.mxu1 %v861_v43  ;;  %v725_v43 = vld [vmem:[%s1126_s4] ss:$0 sm:$0xff] }
  0x2b   :  { %763 = vmatpush3.bf16.msra.mxu0 %v862_v44  ;;  %785 = vmatpush3.bf16.msra.mxu1 %v863_v45 }
  0x2c   :  { %764 = vmatprep.subr.bf16.mxu0 %v864_v46  ;;  %786 = vmatprep.subr.bf16.mxu1 %v865_v47 }
  0x2f   :  { %765 = vmatpush3.bf16.msra.mxu0 %v866_v48  ;;  %787 = vmatpush3.bf16.msra.mxu1 %v867_v49 }
  0x30   :  { %766 = vmatprep.subr.bf16.mxu0 %v868_v50  ;;  %788 = vmatprep.subr.bf16.mxu1 %v869_v51 }
  0x33   :  { %767 = vmatpush3.bf16.msra.mxu0 %v870_v52  ;;  %789 = vmatpush3.bf16.msra.mxu1 %v871_v53 }
  0x34   :  { %768 = vmatprep.subr.bf16.mxu0 %v872_v54  ;;  %790 = vmatprep.subr.bf16.mxu1 %v873_v55 }
  0x37   :  { %769 = vmatpush3.bf16.msra.mxu0 %v874_v56  ;;  %791 = vmatpush3.bf16.msra.mxu1 %v875_v57 }
  0x38   :  { %770 = vmatprep.subr.bf16.mxu0 %v876_v58  ;;  %792 = vmatprep.subr.bf16.mxu1 %v877_v59 }
  0x3b   :  { %771 = vmatpush3.bf16.msra.mxu0 %v878_v60  ;;  %793 = vmatpush3.bf16.msra.mxu1 %v879_v61 }
  0x3c   :  { %772 = vmatprep.subr.bf16.mxu0 %v880_v62  ;;  %794 = vmatprep.subr.bf16.mxu1 %v881_v63 }
  0x3f   :  { %773 = vmatpush3.bf16.msra.mxu0 %v882_v0  ;;  %795 = vmatpush3.bf16.msra.mxu1 %v883_v1 }
  0xf5   :  { %v277_v13 = vpop.f32.mrb[0].mxu0  ;;  %v320_v14 = vpop.f32.mrb[0].mxu1 }
  0xf6   :  { %v278_v15 = vadd.f32 %v277_v13, %v60_v9  ;;  %v321_v16 = vadd.f32 %v320_v14, %v68_v10  ;;  %v279_v17 = vpop.f32.mrb[1].mxu0  ;;  %v322_v18 = vpop.f32.mrb[1].mxu1 }
  0xf7   :  { %v280_v19 = vadd.f32 %v279_v17, %v64_v11  ;;  %v323_v20 = vadd.f32 %v322_v18, %v72_v12  ;;  %v281_v21 = vpop.f32.mrb[2].mxu0  ;;  %v324_v22 = vpop.f32.mrb[2].mxu1 }
  0xf8   :  { %v331_v23 = vmax.f32 %v321_v16, 0.0  ;;  %v282_v24 = vadd.f32 %v281_v21, %v60_v9  ;;  %v325_v25 = vadd.f32 %v324_v22, %v68_v10  ;;  %v283_v26 = vpop.f32.mrb[3].mxu0  ;;  %v326_v27 = vpop.f32.mrb[3].mxu1  ;;  %v329_v31 = vmax.f32 %v278_v15, 0.0 }
  0xf9   :  { %v332_v28 = vmax.f32 %v323_v20, 0.0  ;;  %v284_v29 = vadd.f32 %v283_v26, %v64_v11  ;;  %v327_v30 = vadd.f32 %v326_v27, %v72_v12  ;;  %v330_v34 = vmax.f32 %v280_v19, 0.0 }
  0xfa   :  { %v333_v32 = vmax.f32 %v282_v24, 0.0  ;;  %v335_v33 = vmax.f32 %v325_v25, 0.0 }
  0xfb   :  { %v334_v35 = vmax.f32 %v284_v29, 0.0  ;;  %v336_v36 = vmax.f32 %v327_v30, 0.0 }
  0xfc   :  { %v337_v37 = vpack.c.bf16 %v333_v32, %v329_v31  ;;  %v339_v38 = vpack.c.bf16 %v335_v33, %v331_v23 }
  0xfd   :  { %v338_v39 = vpack.c.bf16 %v334_v35, %v330_v34  ;;  %v340_v40 = vpack.c.bf16 %v336_v36, %v332_v28 }
  0xff   :  { %636 = vmatprep.mubr.bf16.mxu0 %v338_v39  ;;  %677 = vmatprep.mubr.bf16.mxu1 %v340_v40 }
 0x100   :  { %637 = vmatmul.mubr.bf16.vlgmr.msra.gmra.mrb[4].mxu0 %v337_v37  ;;  %678 = vmatmul.mubr.bf16.vlgmr.msra.gmra.mrb[4].mxu1 %v339_v38 }
 0x1d3   :  { %v774_v41 = vpop.f32.mrb[4].mxu0  ;;  %v796_v42 = vpop.f32.mrb[4].mxu1 }
 0x1d4   :  { %v775_v44 = vpop.f32.mrb[5].mxu0  ;;  %v797_v45 = vpop.f32.mrb[5].mxu1 }
 0x1d5   :  { %v776_v46 = vadd.f32 %v775_v44, %v774_v41  ;;  %v798_v47 = vadd.f32 %v797_v45, %v796_v42  ;;  %v777_v48 = vpop.f32.mrb[6].mxu0  ;;  %v799_v49 = vpop.f32.mrb[6].mxu1 }
 0x1d6   :  { %v778_v50 = vpop.f32.mrb[7].mxu0  ;;  %v800_v51 = vpop.f32.mrb[7].mxu1 }
 0x1d7   :  { %v639_v52 = vadd.f32 %v776_v46, %v725_v43  ;;  %v779_v53 = vadd.f32 %v778_v50, %v777_v48  ;;  %v801_v54 = vadd.f32 %v800_v51, %v799_v49 }
 0x1d9   :  { %v680_v55 = vadd.f32 %v798_v47, %v639_v52  ;;  %v642_v56 = vadd.f32 %v779_v53, %v725_v43 }
 0x1db   :  { %686 = vst [vmem:[%s1127_s5] sm:$0xff] %v680_v55  ;;  %v683_v57 = vadd.f32 %v801_v54, %v642_v56 }
 0x1dd   :  { %687 = vst [vmem:[%s1127_s5 + $0x8] sm:$0xff] %v683_v57 }

// kernel: dqn_forward.6
= control target key start
LH: loop header
LB: loop body
LE: loop exit
PB: predicated region body
PF: predicated region fallthrough
CT: control target
= control target key end

     0   :  { %vm1171_vm0 = vmmov 0   ;;  %s1441_s1 = inlined_call_operand.vmem [shape: bf16[1152,128], index: 1, kind: input, shape index: {}]   ;;  %s1442_s0 = inlined_call_operand.vmem [shape: bf16[16,1152], index: 0, kind: input, shape index: {}]   ;;  %s1443_s2 = inlined_call_operand.vmem [shape: f32[1,128], index: 2, kind: input, shape index: {}]   ;;  %s1444_s3 = inlined_call_operand.vmem [shape: bf16[16,128], index: 3, kind: output, shape index: {}]  }
   0x1   :  { %v1085_v0 = vld [vmem:[%s1441_s1 + $0x40] sm:$0xff]   ;;  %v1089_v4 = vld [vmem:[%s1441_s1 + $0x48] sm:$0xff]   ;;  %v1093_v8 = vld [vmem:[%s1441_s1 + $0x50] sm:$0xff]  }
   0x2   :  { %v1086_v1 = vld [vmem:[%s1441_s1] sm:$0xff]   ;;  %966 = vmatprep.subr.bf16.mxu0 %v1085_v0  ;;  %v1090_v5 = vld [vmem:[%s1441_s1 + $0x8] sm:$0xff]   ;;  %v1094_v9 = vld [vmem:[%s1441_s1 + $0x10] sm:$0xff]  }
   0x3   :  { %v1087_v2 = vld [vmem:[%s1441_s1 + $0xc0] sm:$0xff]   ;;  %967 = vmatpush3.bf16.msra.mxu0 %v1086_v1  ;;  %v1091_v6 = vld [vmem:[%s1441_s1 + $0xc8] sm:$0xff]   ;;  %v1095_v10 = vld [vmem:[%s1441_s1 + $0xd0] sm:$0xff]  }
   0x4   :  { %v1088_v3 = vld [vmem:[%s1441_s1 + $0x80] sm:$0xff]   ;;  %988 = vmatprep.subr.bf16.mxu1 %v1087_v2  ;;  %968 = vmatprep.subr.bf16.mxu0 %v1089_v4  ;;  %v1092_v7 = vld [vmem:[%s1441_s1 + $0x88] sm:$0xff]   ;;  %v1096_v11 = vld [vmem:[%s1441_s1 + $0x90] sm:$0xff]  }
   0x5   :  { %989 = vmatpush3.bf16.msra.mxu1 %v1088_v3  ;;  %v1097_v12 = vld [vmem:[%s1441_s1 + $0x58] sm:$0xff]   ;;  %v1101_v16 = vld [vmem:[%s1441_s1 + $0x60] sm:$0xff]   ;;  %v1105_v20 = vld [vmem:[%s1441_s1 + $0x68] sm:$0xff]  }
   0x6   :  { %990 = vmatprep.subr.bf16.mxu1 %v1091_v6  ;;  %v1098_v13 = vld [vmem:[%s1441_s1 + $0x18] sm:$0xff]   ;;  %v1102_v17 = vld [vmem:[%s1441_s1 + $0x20] sm:$0xff]   ;;  %v1106_v21 = vld [vmem:[%s1441_s1 + $0x28] sm:$0xff]   ;;  %v1170_v6 = vmov 0.0  }
   0x7   :  { %969 = vmatpush3.bf16.msra.mxu0 %v1090_v5  ;;  %v1099_v14 = vld [vmem:[%s1441_s1 + $0xd8] sm:$0xff]   ;;  %v1103_v18 = vld [vmem:[%s1441_s1 + $0xe0] sm:$0xff]   ;;  %v1107_v22 = vld [vmem:[%s1441_s1 + $0xe8] sm:$0xff]  }
   0x8   :  { %970 = vmatprep.subr.bf16.mxu0 %v1093_v8  ;;  %v1100_v15 = vld [vmem:[%s1441_s1 + $0x98] sm:$0xff]   ;;  %v1104_v19 = vld [vmem:[%s1441_s1 + $0xa0] sm:$0xff]   ;;  %v1108_v23 = vld [vmem:[%s1441_s1 + $0xa8] sm:$0xff]  }
   0x9   :  { %991 = vmatpush3.bf16.msra.mxu1 %v1092_v7  ;;  %v1109_v24 = vld [vmem:[%s1441_s1 + $0x70] sm:$0xff]   ;;  %v1113_v28 = vld [vmem:[%s1441_s1 + $0x78] sm:$0xff]   ;;  %v1116_v31 = vld [vmem:[%s1442_s0] ss:$36 sps:$4 sm:$0xff]  }
   0xa   :  { %992 = vmatprep.subr.bf16.mxu1 %v1095_v10  ;;  %v1110_v25 = vld [vmem:[%s1441_s1 + $0x30] sm:$0xff]   ;;  %v1114_v29 = vld [vmem:[%s1441_s1 + $0x38] sm:$0xff]   ;;  %v1118_v32 = vld [vmem:[%s1442_s0 + $0x4] ss:$36 sps:$4 sm:$0xff]  }
   0xb   :  { %971 = vmatpush3.bf16.msra.mxu0 %v1094_v9  ;;  %v1111_v26 = vld [vmem:[%s1441_s1 + $0xf0] sm:$0xff]   ;;  %v1115_v30 = vld [vmem:[%s1441_s1 + $0xf8] sm:$0xff]   ;;  %686 = vmatprep.mubr.bf16.mxu0 %v1118_v32  ;;  %v1120_v34 = vld [vmem:[%s1441_s1 + $0x140] sm:$0xff]  }
   0xc   :  { %972 = vmatprep.subr.bf16.mxu0 %v1097_v12  ;;  %v1112_v27 = vld [vmem:[%s1441_s1 + $0xb0] sm:$0xff]   ;;  %v1119_v33 = vld [vmem:[%s1441_s1 + $0xb8] sm:$0xff]   ;;  %v1121_v35 = vld [vmem:[%s1442_s0 + $0x8] ss:$36 sps:$4 sm:$0xff]  }
   0xd   :  { %993 = vmatpush3.bf16.msra.mxu1 %v1096_v11  ;;  %v1123_v36 = vld [vmem:[%s1442_s0 + $0xc] ss:$36 sps:$4 sm:$0xff]   ;;  %v1124_v37 = vld [vmem:[%s1441_s1 + $0x100] sm:$0xff]   ;;  %v1135_v48 = vld [vmem:[%s1441_s1 + $0x158] sm:$0xff]  }
   0xe   :  { %994 = vmatprep.subr.bf16.mxu1 %v1099_v14  ;;  %727 = vmatprep.mubr.bf16.mxu1 %v1123_v36  ;;  %v1125_v38 = vld [vmem:[%s1441_s1 + $0x1c0] sm:$0xff]   ;;  %v1127_v40 = vld [vmem:[%s1441_s1 + $0x148] sm:$0xff]   ;;  %v1131_v44 = vld [vmem:[%s1441_s1 + $0x150] sm:$0xff]  }
   0xf   :  { %973 = vmatpush3.bf16.msra.mxu0 %v1098_v13  ;;  %v1126_v39 = vld [vmem:[%s1441_s1 + $0x180] sm:$0xff]   ;;  %v1128_v41 = vld [vmem:[%s1441_s1 + $0x108] sm:$0xff]   ;;  %v1132_v45 = vld [vmem:[%s1441_s1 + $0x110] sm:$0xff]  }
  0x10   :  { %974 = vmatprep.subr.bf16.mxu0 %v1101_v16  ;;  %v1129_v42 = vld [vmem:[%s1441_s1 + $0x1c8] sm:$0xff]   ;;  %v1133_v46 = vld [vmem:[%s1441_s1 + $0x1d0] sm:$0xff]   ;;  %v1136_v49 = vld [vmem:[%s1441_s1 + $0x118] sm:$0xff]  }
  0x11   :  { %995 = vmatpush3.bf16.msra.mxu1 %v1100_v15  ;;  %v1130_v43 = vld [vmem:[%s1441_s1 + $0x188] sm:$0xff]   ;;  %v1134_v47 = vld [vmem:[%s1441_s1 + $0x190] sm:$0xff]   ;;  %v1137_v50 = vld [vmem:[%s1441_s1 + $0x1d8] sm:$0xff]  }
  0x12   :  { %996 = vmatprep.subr.bf16.mxu1 %v1103_v18  ;;  %v1138_v51 = vld [vmem:[%s1441_s1 + $0x198] sm:$0xff]   ;;  %v1139_v52 = vld [vmem:[%s1441_s1 + $0x160] sm:$0xff]   ;;  %v1143_v56 = vld [vmem:[%s1441_s1 + $0x168] sm:$0xff]  }
  0x13   :  { %975 = vmatpush3.bf16.msra.mxu0 %v1102_v17  ;;  %v1140_v53 = vld [vmem:[%s1441_s1 + $0x120] sm:$0xff]   ;;  %v1144_v57 = vld [vmem:[%s1441_s1 + $0x128] sm:$0xff]   ;;  %v1147_v60 = vld [vmem:[%s1441_s1 + $0x170] sm:$0xff]  }
  0x14   :  { %976 = vmatprep.subr.bf16.mxu0 %v1105_v20  ;;  %v1141_v54 = vld [vmem:[%s1441_s1 + $0x1e0] sm:$0xff]   ;;  %v1145_v58 = vld [vmem:[%s1441_s1 + $0x1e8] sm:$0xff]   ;;  %v1148_v61 = vld [vmem:[%s1441_s1 + $0x130] sm:$0xff]  }
  0x15   :  { %997 = vmatpush3.bf16.msra.mxu1 %v1104_v19  ;;  %v1142_v55 = vld [vmem:[%s1441_s1 + $0x1a0] sm:$0xff]   ;;  %v1146_v59 = vld [vmem:[%s1441_s1 + $0x1a8] sm:$0xff]   ;;  %v1149_v62 = vld [vmem:[%s1441_s1 + $0x1f0] sm:$0xff]  }
  0x16   :  { %998 = vmatprep.subr.bf16.mxu1 %v1107_v22  ;;  %v1150_v63 = vld [vmem:[%s1441_s1 + $0x1b0] sm:$0xff]   ;;  %v1151_v0 = vld [vmem:[%s1441_s1 + $0x178] sm:$0xff]   ;;  %v1161_v9 = vld [vmem:[%s1441_s1 + $0x200] sm:$0xff]  }
  0x17   :  { %977 = vmatpush3.bf16.msra.mxu0 %v1106_v21  ;;  %v1152_v1 = vld [vmem:[%s1441_s1 + $0x138] sm:$0xff]   ;;  %v1154_v3 = vld [vmem:[%s1442_s0 + $0x10] ss:$36 sps:$4 sm:$0xff]   ;;  %v1162_v10 = vld [vmem:[%s1441_s1 + $0x208] sm:$0xff]  }
  0x18   :  { %978 = vmatprep.subr.bf16.mxu0 %v1109_v24  ;;  %v1153_v2 = vld [vmem:[%s1441_s1 + $0x1f8] sm:$0xff]   ;;  %v1163_v11 = vld [vmem:[%s1441_s1 + $0x210] sm:$0xff]   ;;  %v1165_v13 = vld [vmem:[%s1441_s1 + $0x220] sm:$0xff]  }
  0x19   :  { %999 = vmatpush3.bf16.msra.mxu1 %v1108_v23  ;;  %v1156_v4 = vld [vmem:[%s1442_s0 + $0x14] ss:$36 sps:$4 sm:$0xff]   ;;  %v1160_v8 = vld [vmem:[%s1442_s0 + $0x1c] ss:$36 sps:$4 sm:$0xff]   ;;  %v1166_v14 = vld [vmem:[%s1441_s1 + $0x228] sm:$0xff]  }
  0x1a   :  { %1000 = vmatprep.subr.bf16.mxu1 %v1111_v26  ;;  %v1157_v5 = vld [vmem:[%s1441_s1 + $0x1b8] sm:$0xff]   ;;  %v1167_v15 = vld [vmem:[%s1441_s1 + $0x230] sm:$0xff]   ;;  %v1169_v17 = vld [vmem:[%s1442_s0 + $0x20] ss:$36 sps:$4 sm:$0xff]  }
  0x1b   :  { %979 = vmatpush3.bf16.msra.mxu0 %v1110_v25  ;;  %v1158_v7 = vld [vmem:[%s1442_s0 + $0x18] ss:$36 sps:$4 sm:$0xff]   ;;  %v875_v19 = vld [vmem:[%s1443_s2] ss:$0 sm:$0xff] }
  0x1c   :  { %980 = vmatprep.subr.bf16.mxu0 %v1113_v28  ;;  %v1164_v12 = vld [vmem:[%s1441_s1 + $0x218] sm:$0xff]  }
  0x1d   :  { %1001 = vmatpush3.bf16.msra.mxu1 %v1112_v27  ;;  %v1168_v16 = vld [vmem:[%s1441_s1 + $0x238] sm:$0xff]  }
  0x1e   :  { %1002 = vmatprep.subr.bf16.mxu1 %v1115_v30 }
  0x1f   :  { %981 = vmatpush3.bf16.msra.mxu0 %v1114_v29 }
  0x20   :  { %1010 = vmatprep.subr.bf16.mxu0 %v1120_v34 }
  0x21   :  { %1003 = vmatpush3.bf16.msra.mxu1 %v1119_v33 }
  0x22   :  { %687 = vmatmul.mubr.bf16.vlgmr.msra.gmra.mrb[0].mxu0 %v1116_v31  ;;  %1032 = vmatprep.subr.bf16.mxu1 %v1125_v38 }
  0x23   :  { %1011 = vmatpush3.bf16.msra.mxu0 %v1124_v37  ;;  %768 = vmatprep.mubr.bf16.mxu0 %v1156_v4 }
  0x24   :  { %728 = vmatmul.mubr.bf16.vlgmr.msra.gmra.mrb[0].mxu1 %v1121_v35  ;;  %1012 = vmatprep.subr.bf16.mxu0 %v1127_v40 }
  0x25   :  { %1033 = vmatpush3.bf16.msra.mxu1 %v1126_v39  ;;  %809 = vmatprep.mubr.bf16.mxu1 %v1160_v8 }
  0x26   :  { %1034 = vmatprep.subr.bf16.mxu1 %v1129_v42 }
  0x27   :  { %1013 = vmatpush3.bf16.msra.mxu0 %v1128_v41 }
  0x28   :  { %1014 = vmatprep.subr.bf16.mxu0 %v1131_v44 }
  0x29   :  { %1035 = vmatpush3.bf16.msra.mxu1 %v1130_v43 }
  0x2a   :  { %1036 = vmatprep.subr.bf16.mxu1 %v1133_v46 }
  0x2b   :  { %1015 = vmatpush3.bf16.msra.mxu0 %v1132_v45 }
  0x2c   :  { %1016 = vmatprep.subr.bf16.mxu0 %v1135_v48 }
  0x2d   :  { %1037 = vmatpush3.bf16.msra.mxu1 %v1134_v47 }
  0x2e   :  { %1038 = vmatprep.subr.bf16.mxu1 %v1137_v50 }
  0x2f   :  { %1017 = vmatpush3.bf16.msra.mxu0 %v1136_v49 }
  0x30   :  { %1018 = vmatprep.subr.bf16.mxu0 %v1139_v52 }
  0x31   :  { %1039 = vmatpush3.bf16.msra.mxu1 %v1138_v51 }
  0x32   :  { %1040 = vmatprep.subr.bf16.mxu1 %v1141_v54 }
  0x33   :  { %1019 = vmatpush3.bf16.msra.mxu0 %v1140_v53 }
  0x34   :  { %1020 = vmatprep.subr.bf16.mxu0 %v1143_v56 }
  0x35   :  { %1041 = vmatpush3.bf16.msra.mxu1 %v1142_v55 }
  0x36   :  { %1042 = vmatprep.subr.bf16.mxu1 %v1145_v58 }
  0x37   :  { %1021 = vmatpush3.bf16.msra.mxu0 %v1144_v57 }
  0x38   :  { %1022 = vmatprep.subr.bf16.mxu0 %v1147_v60 }
  0x39   :  { %1043 = vmatpush3.bf16.msra.mxu1 %v1146_v59 }
  0x3a   :  { %1044 = vmatprep.subr.bf16.mxu1 %v1149_v62 }
  0x3b   :  { %1023 = vmatpush3.bf16.msra.mxu0 %v1148_v61 }
  0x3c   :  { %1024 = vmatprep.subr.bf16.mxu0 %v1151_v0 }
  0x3d   :  { %1045 = vmatpush3.bf16.msra.mxu1 %v1150_v63 }
  0x3e   :  { %1046 = vmatprep.subr.bf16.mxu1 %v1153_v2 }
  0x3f   :  { %1025 = vmatpush3.bf16.msra.mxu0 %v1152_v1 }
  0x40   :  { %1063 = vmatprep.subr.bf16.mxu0 %v1170_v6 }
  0x41   :  { %1047 = vmatpush3.bf16.msra.mxu1 %v1157_v5 }
  0x42   :  { %769 = vmatmul.mubr.bf16.vlgmr.msra.gmra.mrb[4].mxu0 %v1154_v3 }
  0x43   :  { %1079 = vmatprep.mubr.msk.bf16.mxu0 %vm1171_vm0, %v1170_v6  ;;  %1064 = vmatpush3.bf16.msra.mxu0 %v1161_v9 }
  0x44   :  { %810 = vmatmul.mubr.bf16.vlgmr.msra.gmra.mrb[4].mxu1 %v1158_v7  ;;  %1065 = vmatprep.subr.bf16.mxu0 %v1170_v6 }
  0x47   :  { %1066 = vmatpush3.bf16.msra.mxu0 %v1162_v10 }
  0x48   :  { %1067 = vmatprep.subr.bf16.mxu0 %v1170_v6 }
  0x4b   :  { %1068 = vmatpush3.bf16.msra.mxu0 %v1163_v11 }
  0x4c   :  { %1069 = vmatprep.subr.bf16.mxu0 %v1170_v6 }
  0x4f   :  { %1070 = vmatpush3.bf16.msra.mxu0 %v1164_v12 }
  0x50   :  { %1071 = vmatprep.subr.bf16.mxu0 %v1170_v6 }
  0x53   :  { %1072 = vmatpush3.bf16.msra.mxu0 %v1165_v13 }
  0x54   :  { %1073 = vmatprep.subr.bf16.mxu0 %v1170_v6 }
  0x57   :  { %1074 = vmatpush3.bf16.msra.mxu0 %v1166_v14 }
  0x58   :  { %1075 = vmatprep.subr.bf16.mxu0 %v1170_v6 }
  0x5b   :  { %1076 = vmatpush3.bf16.msra.mxu0 %v1167_v15 }
  0x5c   :  { %1077 = vmatprep.subr.bf16.mxu0 %v1170_v6 }
  0x5f   :  { %1078 = vmatpush3.bf16.msra.mxu0 %v1168_v16 }
  0x62   :  { %1080 = vmatmul.mubr.bf16.vlgmr.msra.gmra.mrb[8].mxu0 %v1169_v17 }
  0xf5   :  { %v982_v18 = vpop.f32.mrb[0].mxu0 }
  0xf6   :  { %v983_v20 = vpop.f32.mrb[1].mxu0 }
  0xf7   :  { %v984_v21 = vadd.f32 %v983_v20, %v982_v18  ;;  %v985_v22 = vpop.f32.mrb[2].mxu0  ;;  %v1004_v23 = vpop.f32.mrb[0].mxu1 }
  0xf8   :  { %v986_v24 = vpop.f32.mrb[3].mxu0  ;;  %v1005_v27 = vpop.f32.mrb[1].mxu1 }
  0xf9   :  { %v689_v25 = vadd.f32 %v984_v21, %v875_v19  ;;  %v987_v26 = vadd.f32 %v986_v24, %v985_v22  ;;  %v1006_v28 = vadd.f32 %v1005_v27, %v1004_v23  ;;  %v1007_v29 = vpop.f32.mrb[2].mxu1 }
  0xfa   :  { %v1008_v31 = vpop.f32.mrb[3].mxu1 }
  0xfb   :  { %v692_v30 = vadd.f32 %v987_v26, %v875_v19  ;;  %v730_v32 = vadd.f32 %v1006_v28, %v689_v25  ;;  %v1009_v33 = vadd.f32 %v1008_v31, %v1007_v29 }
  0xfd   :  { %v733_v34 = vadd.f32 %v1009_v33, %v692_v30 }
 0x115   :  { %v1026_v35 = vpop.f32.mrb[4].mxu0 }
 0x116   :  { %v1027_v36 = vpop.f32.mrb[5].mxu0 }
 0x117   :  { %v1028_v37 = vadd.f32 %v1027_v36, %v1026_v35  ;;  %v1029_v38 = vpop.f32.mrb[6].mxu0  ;;  %v1048_v39 = vpop.f32.mrb[4].mxu1 }
 0x118   :  { %v1030_v40 = vpop.f32.mrb[7].mxu0  ;;  %v1049_v43 = vpop.f32.mrb[5].mxu1 }
 0x119   :  { %v771_v41 = vadd.f32 %v1028_v37, %v730_v32  ;;  %v1031_v42 = vadd.f32 %v1030_v40, %v1029_v38  ;;  %v1050_v44 = vadd.f32 %v1049_v43, %v1048_v39  ;;  %v1051_v45 = vpop.f32.mrb[6].mxu1 }
 0x11a   :  { %v1052_v47 = vpop.f32.mrb[7].mxu1 }
 0x11b   :  { %v774_v46 = vadd.f32 %v1031_v42, %v733_v34  ;;  %v1053_v48 = vadd.f32 %v1052_v47, %v1051_v45  ;;  %v812_v49 = vadd.f32 %v1050_v44, %v771_v41 }
 0x11d   :  { %v815_v50 = vadd.f32 %v1053_v48, %v774_v46 }
 0x135   :  { %v852_v51 = vpop.f32.mrb[8].mxu0 }
 0x136   :  { %v853_v52 = vadd.f32 %v852_v51, %v812_v49  ;;  %v1081_v53 = vpop.f32.mrb[9].mxu0 }
 0x137   :  { %v855_v54 = vpop.f32.mrb[10].mxu0 }
 0x138   :  { %v856_v55 = vadd.f32 %v855_v54, %v815_v50  ;;  %v1082_v56 = vpop.f32.mrb[11].mxu0  ;;  %v859_v57 = vmax.f32 %v853_v52, 0.0 }
 0x13a   :  { %v860_v58 = vmax.f32 %v856_v55, 0.0 }
 0x13c   :  { %v964_v59 = vpack.c.bf16 %v860_v58, %v859_v57 }
 0x13e   :  { %965 = vst [vmem:[%s1444_s3] sm:$0xff] %v964_v59  }

// kernel: dqn_forward.5
= control target key start
LH: loop header
LB: loop body
LE: loop exit
PB: predicated region body
PF: predicated region fallthrough
CT: control target
= control target key end

     0   :  { %s2699_s1 = inlined_call_operand.vmem [shape: bf16[2048,128], index: 1, kind: input, shape index: {}]   ;;  %s2700_s0 = inlined_call_operand.vmem [shape: bf16[32,2048], index: 0, kind: input, shape index: {}]   ;;  %s2701_s2 = inlined_call_operand.vmem [shape: f32[1,128], index: 2, kind: input, shape index: {}]   ;;  %s2702_s3 = inlined_call_operand.vmem [shape: bf16[32,128], index: 3, kind: output, shape index: {}]  }
   0x1   :  { %v2062_v0 = vld [vmem:[%s2699_s1 + $0x40] sm:$0xff]   ;;  %v2066_v4 = vld [vmem:[%s2699_s1 + $0x48] sm:$0xff]   ;;  %v2070_v8 = vld [vmem:[%s2699_s1 + $0x50] sm:$0xff]  }
   0x2   :  { %v2063_v1 = vld [vmem:[%s2699_s1 + $0xc0] sm:$0xff]   ;;  %1838 = vmatprep.subr.bf16.mxu0 %v2062_v0  ;;  %v2067_v5 = vld [vmem:[%s2699_s1 + $0xc8] sm:$0xff]   ;;  %v2071_v9 = vld [vmem:[%s2699_s1 + $0xd0] sm:$0xff]  }
   0x3   :  { %v2064_v2 = vld [vmem:[%s2699_s1] sm:$0xff]   ;;  %1866 = vmatprep.subr.bf16.mxu1 %v2063_v1  ;;  %v2068_v6 = vld [vmem:[%s2699_s1 + $0x8] sm:$0xff]   ;;  %v2072_v10 = vld [vmem:[%s2699_s1 + $0x10] sm:$0xff]  }
   0x4   :  { %v2065_v3 = vld [vmem:[%s2699_s1 + $0x80] sm:$0xff]   ;;  %1839 = vmatpush3.bf16.msra.mxu0 %v2064_v2  ;;  %v2069_v7 = vld [vmem:[%s2699_s1 + $0x88] sm:$0xff]   ;;  %v2073_v11 = vld [vmem:[%s2699_s1 + $0x90] sm:$0xff]  }
   0x5   :  { %1867 = vmatpush3.bf16.msra.mxu1 %v2065_v3  ;;  %1840 = vmatprep.subr.bf16.mxu0 %v2066_v4  ;;  %v2074_v12 = vld [vmem:[%s2699_s1 + $0x58] sm:$0xff]   ;;  %v2078_v16 = vld [vmem:[%s2699_s1 + $0x60] sm:$0xff]   ;;  %v2082_v20 = vld [vmem:[%s2699_s1 + $0x68] sm:$0xff]  }
   0x6   :  { %1868 = vmatprep.subr.bf16.mxu1 %v2067_v5  ;;  %v2075_v13 = vld [vmem:[%s2699_s1 + $0xd8] sm:$0xff]   ;;  %v2079_v17 = vld [vmem:[%s2699_s1 + $0xe0] sm:$0xff]   ;;  %v2083_v21 = vld [vmem:[%s2699_s1 + $0xe8] sm:$0xff]  }
   0x7   :  { %v2076_v14 = vld [vmem:[%s2699_s1 + $0x18] sm:$0xff]   ;;  %v2080_v18 = vld [vmem:[%s2699_s1 + $0x20] sm:$0xff]   ;;  %v2084_v22 = vld [vmem:[%s2699_s1 + $0x28] sm:$0xff]  }
   0x8   :  { %1841 = vmatpush3.bf16.msra.mxu0 %v2068_v6  ;;  %v2077_v15 = vld [vmem:[%s2699_s1 + $0x98] sm:$0xff]   ;;  %v2081_v19 = vld [vmem:[%s2699_s1 + $0xa0] sm:$0xff]   ;;  %v2085_v23 = vld [vmem:[%s2699_s1 + $0xa8] sm:$0xff]  }
   0x9   :  { %1869 = vmatpush3.bf16.msra.mxu1 %v2069_v7  ;;  %1842 = vmatprep.subr.bf16.mxu0 %v2070_v8  ;;  %v2086_v24 = vld [vmem:[%s2699_s1 + $0x70] sm:$0xff]   ;;  %v2090_v28 = vld [vmem:[%s2699_s1 + $0x78] sm:$0xff]   ;;  %v15_v32 = vld [vmem:[%s2700_s0] sm:$0xff] }
   0xa   :  { %1870 = vmatprep.subr.bf16.mxu1 %v2071_v9  ;;  %v2087_v25 = vld [vmem:[%s2699_s1 + $0xf0] sm:$0xff]   ;;  %v2091_v29 = vld [vmem:[%s2699_s1 + $0xf8] sm:$0xff]   ;;  %v23_v33 = vld [vmem:[%s2700_s0 + $0x40] sm:$0xff] }
   0xb   :  { %v2088_v26 = vld [vmem:[%s2699_s1 + $0x30] sm:$0xff]   ;;  %v2092_v30 = vld [vmem:[%s2699_s1 + $0x38] sm:$0xff]   ;;  %v16_v34 = vld [vmem:[%s2700_s0 + $0x8] sm:$0xff]  ;;  %v1659_v35 = vcombine.low %v15_v32, %v23_v33  ;;  %v1660_v36 = vcombine.high %v15_v32, %v23_v33 }
   0xc   :  { %1843 = vmatpush3.bf16.msra.mxu0 %v2072_v10  ;;  %v2089_v27 = vld [vmem:[%s2699_s1 + $0xb0] sm:$0xff]   ;;  %v2093_v31 = vld [vmem:[%s2699_s1 + $0xb8] sm:$0xff]   ;;  %v24_v37 = vld [vmem:[%s2700_s0 + $0x48] sm:$0xff] }
   0xd   :  { %1871 = vmatpush3.bf16.msra.mxu1 %v2073_v11  ;;  %1844 = vmatprep.subr.bf16.mxu0 %v2074_v12  ;;  %v1661_v38 = vcombine.low %v16_v34, %v24_v37  ;;  %v1662_v39 = vcombine.high %v16_v34, %v24_v37  ;;  %v2094_v40 = vld [vmem:[%s2699_s1 + $0x140] sm:$0xff]   ;;  %v2098_v44 = vld [vmem:[%s2699_s1 + $0x148] sm:$0xff]   ;;  %v2102_v48 = vld [vmem:[%s2699_s1 + $0x150] sm:$0xff]  }
   0xe   :  { %1872 = vmatprep.subr.bf16.mxu1 %v2075_v13  ;;  %1270 = vmatprep.mubr.bf16.mxu0 %v1660_v36  ;;  %v2095_v41 = vld [vmem:[%s2699_s1 + $0x1c0] sm:$0xff]   ;;  %v2099_v45 = vld [vmem:[%s2699_s1 + $0x1c8] sm:$0xff]   ;;  %v2103_v49 = vld [vmem:[%s2699_s1 + $0x1d0] sm:$0xff]  }
   0xf   :  { %1319 = vmatprep.mubr.bf16.mxu1 %v1662_v39  ;;  %v2096_v42 = vld [vmem:[%s2699_s1 + $0x100] sm:$0xff]   ;;  %v2100_v46 = vld [vmem:[%s2699_s1 + $0x108] sm:$0xff]   ;;  %v2104_v50 = vld [vmem:[%s2699_s1 + $0x110] sm:$0xff]  }
  0x10   :  { %1845 = vmatpush3.bf16.msra.mxu0 %v2076_v14  ;;  %v2097_v43 = vld [vmem:[%s2699_s1 + $0x180] sm:$0xff]   ;;  %v2101_v47 = vld [vmem:[%s2699_s1 + $0x188] sm:$0xff]   ;;  %v2105_v51 = vld [vmem:[%s2699_s1 + $0x190] sm:$0xff]  }
  0x11   :  { %1873 = vmatpush3.bf16.msra.mxu1 %v2077_v15  ;;  %1846 = vmatprep.subr.bf16.mxu0 %v2078_v16  ;;  %v2106_v52 = vld [vmem:[%s2699_s1 + $0x158] sm:$0xff]   ;;  %v2110_v56 = vld [vmem:[%s2699_s1 + $0x160] sm:$0xff]   ;;  %v2114_v60 = vld [vmem:[%s2699_s1 + $0x168] sm:$0xff]  }
  0x12   :  { %1874 = vmatprep.subr.bf16.mxu1 %v2079_v17  ;;  %v2107_v53 = vld [vmem:[%s2699_s1 + $0x1d8] sm:$0xff]   ;;  %v2111_v57 = vld [vmem:[%s2699_s1 + $0x1e0] sm:$0xff]   ;;  %v2115_v61 = vld [vmem:[%s2699_s1 + $0x1e8] sm:$0xff]  }
  0x13   :  { %v2108_v54 = vld [vmem:[%s2699_s1 + $0x118] sm:$0xff]   ;;  %v2112_v58 = vld [vmem:[%s2699_s1 + $0x120] sm:$0xff]   ;;  %v2116_v1 = vld [vmem:[%s2699_s1 + $0x128] sm:$0xff]  }
  0x14   :  { %1847 = vmatpush3.bf16.msra.mxu0 %v2080_v18  ;;  %v2109_v55 = vld [vmem:[%s2699_s1 + $0x198] sm:$0xff]   ;;  %v2113_v59 = vld [vmem:[%s2699_s1 + $0x1a0] sm:$0xff]   ;;  %v2117_v3 = vld [vmem:[%s2699_s1 + $0x1a8] sm:$0xff]  }
  0x15   :  { %1875 = vmatpush3.bf16.msra.mxu1 %v2081_v19  ;;  %1848 = vmatprep.subr.bf16.mxu0 %v2082_v20  ;;  %v31_v62 = vld [vmem:[%s2700_s0 + $0x80] sm:$0xff]  ;;  %v32_v4 = vld [vmem:[%s2700_s0 + $0x88] sm:$0xff]  ;;  %v2118_v8 = vld [vmem:[%s2699_s1 + $0x170] sm:$0xff]  }
  0x16   :  { %1876 = vmatprep.subr.bf16.mxu1 %v2083_v21  ;;  %v39_v63 = vld [vmem:[%s2700_s0 + $0xc0] sm:$0xff]  ;;  %v40_v5 = vld [vmem:[%s2700_s0 + $0xc8] sm:$0xff]  ;;  %v2119_v9 = vld [vmem:[%s2699_s1 + $0x1f0] sm:$0xff]  }
  0x17   :  { %v1676_v0 = vcombine.high %v31_v62, %v39_v63  ;;  %v1675_v2 = vcombine.low %v31_v62, %v39_v63  ;;  %v1678_v6 = vcombine.high %v32_v4, %v40_v5  ;;  %v1677_v7 = vcombine.low %v32_v4, %v40_v5  ;;  %v2120_v10 = vld [vmem:[%s2699_s1 + $0x130] sm:$0xff]   ;;  %v2122_v12 = vld [vmem:[%s2699_s1 + $0x178] sm:$0xff]   ;;  %v20_v4 = vld [vmem:[%s2700_s0 + $0x28] sm:$0xff] }
  0x18   :  { %1849 = vmatpush3.bf16.msra.mxu0 %v2084_v22  ;;  %v2121_v11 = vld [vmem:[%s2699_s1 + $0x1b0] sm:$0xff]   ;;  %v2123_v13 = vld [vmem:[%s2699_s1 + $0x1f8] sm:$0xff]   ;;  %v28_v5 = vld [vmem:[%s2700_s0 + $0x68] sm:$0xff] }
  0x19   :  { %1877 = vmatpush3.bf16.msra.mxu1 %v2085_v23  ;;  %1850 = vmatprep.subr.bf16.mxu0 %v2086_v24  ;;  %v2124_v14 = vld [vmem:[%s2699_s1 + $0x138] sm:$0xff]   ;;  %v17_v16 = vld [vmem:[%s2700_s0 + $0x10] sm:$0xff]  ;;  %v2126_v24 = vld [vmem:[%s2699_s1 + $0x240] sm:$0xff]  }
  0x1a   :  { %1878 = vmatprep.subr.bf16.mxu1 %v2087_v25  ;;  %v2125_v15 = vld [vmem:[%s2699_s1 + $0x1b8] sm:$0xff]   ;;  %v25_v17 = vld [vmem:[%s2700_s0 + $0x50] sm:$0xff]  ;;  %v2127_v25 = vld [vmem:[%s2699_s1 + $0x2c0] sm:$0xff]  }
  0x1b   :  { %v18_v18 = vld [vmem:[%s2700_s0 + $0x18] sm:$0xff]  ;;  %v1663_v20 = vcombine.low %v17_v16, %v25_v17  ;;  %v1664_v21 = vcombine.high %v17_v16, %v25_v17  ;;  %v33_v32 = vld [vmem:[%s2700_s0 + $0x90] sm:$0xff]  ;;  %v35_v16 = vld [vmem:[%s2700_s0 + $0xa0] sm:$0xff] }
  0x1c   :  { %1851 = vmatpush3.bf16.msra.mxu0 %v2088_v26  ;;  %v26_v19 = vld [vmem:[%s2700_s0 + $0x58] sm:$0xff]  ;;  %v2128_v26 = vld [vmem:[%s2699_s1 + $0x200] sm:$0xff]   ;;  %v41_v33 = vld [vmem:[%s2700_s0 + $0xd0] sm:$0xff] }
  0x1d   :  { %1879 = vmatpush3.bf16.msra.mxu1 %v2089_v27  ;;  %1852 = vmatprep.subr.bf16.mxu0 %v2090_v28  ;;  %v1665_v22 = vcombine.low %v18_v18, %v26_v19  ;;  %v1666_v23 = vcombine.high %v18_v18, %v26_v19  ;;  %v2129_v27 = vld [vmem:[%s2699_s1 + $0x280] sm:$0xff]   ;;  %v2130_v28 = vld [vmem:[%s2699_s1 + $0x248] sm:$0xff]   ;;  %v1680_v34 = vcombine.high %v33_v32, %v41_v33  ;;  %v2134_v36 = vld [vmem:[%s2699_s1 + $0x250] sm:$0xff]  }
  0x1e   :  { %1880 = vmatprep.subr.bf16.mxu1 %v2091_v29  ;;  %v2131_v29 = vld [vmem:[%s2699_s1 + $0x2c8] sm:$0xff]   ;;  %v2135_v37 = vld [vmem:[%s2699_s1 + $0x2d0] sm:$0xff]   ;;  %v42_v39 = vld [vmem:[%s2700_s0 + $0xd8] sm:$0xff] }
  0x1f   :  { %v2156_v62 = vld [vmem:[%s2699_s1 + $0x238] sm:$0xff]   ;;  %v43_v17 = vld [vmem:[%s2700_s0 + $0xe0] sm:$0xff] }
  0x20   :  { %1853 = vmatpush3.bf16.msra.mxu0 %v2092_v30  ;;  %v2132_v30 = vld [vmem:[%s2699_s1 + $0x208] sm:$0xff]   ;;  %v2157_v63 = vld [vmem:[%s2699_s1 + $0x2b8] sm:$0xff]   ;;  %v1684_v18 = vcombine.high %v35_v16, %v43_v17  ;;  %v1683_v19 = vcombine.low %v35_v16, %v43_v17 }
  0x21   :  { %1881 = vmatpush3.bf16.msra.mxu1 %v2093_v31  ;;  %1894 = vmatprep.subr.bf16.mxu0 %v2094_v40  ;;  %v2133_v31 = vld [vmem:[%s2699_s1 + $0x288] sm:$0xff]  }
  0x22   :  { %1922 = vmatprep.subr.bf16.mxu1 %v2095_v41  ;;  %v2136_v41 = vld [vmem:[%s2699_s1 + $0x210] sm:$0xff]  }
  0x23   :  { %1271 = vmatmul.mubr.bf16.vlgmr.msra.gmra.mrb[0].mxu0 %v1659_v35  ;;  %v1679_v35 = vcombine.low %v33_v32, %v41_v33  ;;  %v2174_v32 = vld [vmem:[%s2699_s1 + $0x360] sm:$0xff]  }
  0x24   :  { %1320 = vmatmul.mubr.bf16.vlgmr.msra.gmra.mrb[0].mxu1 %v1661_v38  ;;  %1895 = vmatpush3.bf16.msra.mxu0 %v2096_v42  ;;  %v34_v38 = vld [vmem:[%s2700_s0 + $0x98] sm:$0xff]  ;;  %v2175_v33 = vld [vmem:[%s2699_s1 + $0x3e0] sm:$0xff]  }
  0x25   :  { %1923 = vmatpush3.bf16.msra.mxu1 %v2097_v43  ;;  %1896 = vmatprep.subr.bf16.mxu0 %v2098_v44  ;;  %v1682_v40 = vcombine.high %v34_v38, %v42_v39  ;;  %v1681_v42 = vcombine.low %v34_v38, %v42_v39  ;;  %v2137_v43 = vld [vmem:[%s2699_s1 + $0x290] sm:$0xff]   ;;  %v2138_v44 = vld [vmem:[%s2699_s1 + $0x258] sm:$0xff]   ;;  %v2180_v38 = vld [vmem:[%s2699_s1 + $0x328] sm:$0xff]  }
  0x26   :  { %1924 = vmatprep.subr.bf16.mxu1 %v2099_v45  ;;  %1278 = vmatprep.mubr.bf16.mxu0 %v1676_v0  ;;  %v2139_v45 = vld [vmem:[%s2699_s1 + $0x2d8] sm:$0xff]   ;;  %v19_v0 = vld [vmem:[%s2700_s0 + $0x20] sm:$0xff]  ;;  %v2181_v39 = vld [vmem:[%s2699_s1 + $0x3a8] sm:$0xff]  }
  0x27   :  { %1327 = vmatprep.mubr.bf16.mxu1 %v1678_v6  ;;  %v1669_v6 = vcombine.low %v20_v4, %v28_v5 }
  0x28   :  { %1897 = vmatpush3.bf16.msra.mxu0 %v2100_v46  ;;  %v2140_v46 = vld [vmem:[%s2699_s1 + $0x218] sm:$0xff]  }
  0x29   :  { %1925 = vmatpush3.bf16.msra.mxu1 %v2101_v47  ;;  %1898 = vmatprep.subr.bf16.mxu0 %v2102_v48  ;;  %v2141_v47 = vld [vmem:[%s2699_s1 + $0x298] sm:$0xff]   ;;  %v2142_v48 = vld [vmem:[%s2699_s1 + $0x260] sm:$0xff]  }
  0x2a   :  { %1926 = vmatprep.subr.bf16.mxu1 %v2103_v49  ;;  %v2143_v49 = vld [vmem:[%s2699_s1 + $0x2e0] sm:$0xff]  }
  0x2b   :  { %1279 = vmatmul.mubr.bf16.gmra.mrb[4].mxu0 %v1675_v2 }
  0x2c   :  { %1899 = vmatpush3.bf16.msra.mxu0 %v2104_v50  ;;  %1328 = vmatmul.mubr.bf16.gmra.mrb[4].mxu1 %v1677_v7  ;;  %v2144_v50 = vld [vmem:[%s2699_s1 + $0x220] sm:$0xff]   ;;  %v1670_v7 = vcombine.high %v20_v4, %v28_v5 }
  0x2d   :  { %1927 = vmatpush3.bf16.msra.mxu1 %v2105_v51  ;;  %1900 = vmatprep.subr.bf16.mxu0 %v2106_v52  ;;  %v2145_v51 = vld [vmem:[%s2699_s1 + $0x2a0] sm:$0xff]   ;;  %v2146_v52 = vld [vmem:[%s2699_s1 + $0x268] sm:$0xff]  }
  0x2e   :  { %1928 = vmatprep.subr.bf16.mxu1 %v2107_v53  ;;  %1368 = vmatprep.mubr.bf16.mxu0 %v1664_v21  ;;  %v2147_v53 = vld [vmem:[%s2699_s1 + $0x2e8] sm:$0xff]   ;;  %v2167_v21 = vld [vmem:[%s2699_s1 + $0x3d0] sm:$0xff]  }
  0x2f   :  { %1417 = vmatprep.mubr.bf16.mxu1 %v1666_v23  ;;  %v44_v23 = vld [vmem:[%s2700_s0 + $0xe8] sm:$0xff] }
  0x30   :  { %1901 = vmatpush3.bf16.msra.mxu0 %v2108_v54  ;;  %v2148_v54 = vld [vmem:[%s2699_s1 + $0x228] sm:$0xff]  }
  0x31   :  { %1929 = vmatpush3.bf16.msra.mxu1 %v2109_v55  ;;  %1902 = vmatprep.subr.bf16.mxu0 %v2110_v56  ;;  %v2149_v55 = vld [vmem:[%s2699_s1 + $0x2a8] sm:$0xff]   ;;  %v2150_v56 = vld [vmem:[%s2699_s1 + $0x270] sm:$0xff]  }
  0x32   :  { %1930 = vmatprep.subr.bf16.mxu1 %v2111_v57  ;;  %v2151_v57 = vld [vmem:[%s2699_s1 + $0x2f0] sm:$0xff]  }
  0x34   :  { %1903 = vmatpush3.bf16.msra.mxu0 %v2112_v58  ;;  %v2152_v58 = vld [vmem:[%s2699_s1 + $0x230] sm:$0xff]  }
  0x35   :  { %1931 = vmatpush3.bf16.msra.mxu1 %v2113_v59  ;;  %1904 = vmatprep.subr.bf16.mxu0 %v2114_v60  ;;  %v2153_v59 = vld [vmem:[%s2699_s1 + $0x2b0] sm:$0xff]   ;;  %v2154_v60 = vld [vmem:[%s2699_s1 + $0x278] sm:$0xff]  }
  0x36   :  { %1932 = vmatprep.subr.bf16.mxu1 %v2115_v61  ;;  %v2155_v61 = vld [vmem:[%s2699_s1 + $0x2f8] sm:$0xff]  }
  0x38   :  { %1905 = vmatpush3.bf16.msra.mxu0 %v2116_v1  ;;  %v27_v1 = vld [vmem:[%s2700_s0 + $0x60] sm:$0xff] }
  0x39   :  { %1933 = vmatpush3.bf16.msra.mxu1 %v2117_v3  ;;  %1906 = vmatprep.subr.bf16.mxu0 %v2118_v8  ;;  %v1667_v2 = vcombine.low %v19_v0, %v27_v1  ;;  %v1668_v3 = vcombine.high %v19_v0, %v27_v1  ;;  %v2158_v8 = vld [vmem:[%s2699_s1 + $0x340] sm:$0xff]  }
  0x3a   :  { %1934 = vmatprep.subr.bf16.mxu1 %v2119_v9  ;;  %v2159_v9 = vld [vmem:[%s2699_s1 + $0x3c0] sm:$0xff]  }
  0x3c   :  { %1907 = vmatpush3.bf16.msra.mxu0 %v2120_v10  ;;  %v2160_v10 = vld [vmem:[%s2699_s1 + $0x300] sm:$0xff]  }
  0x3d   :  { %1935 = vmatpush3.bf16.msra.mxu1 %v2121_v11  ;;  %1908 = vmatprep.subr.bf16.mxu0 %v2122_v12  ;;  %v2161_v11 = vld [vmem:[%s2699_s1 + $0x380] sm:$0xff]   ;;  %v2162_v12 = vld [vmem:[%s2699_s1 + $0x348] sm:$0xff]  }
  0x3e   :  { %1936 = vmatprep.subr.bf16.mxu1 %v2123_v13  ;;  %v2163_v13 = vld [vmem:[%s2699_s1 + $0x3c8] sm:$0xff]  }
  0x40   :  { %1909 = vmatpush3.bf16.msra.mxu0 %v2124_v14  ;;  %v2164_v14 = vld [vmem:[%s2699_s1 + $0x308] sm:$0xff]  }
  0x41   :  { %1937 = vmatpush3.bf16.msra.mxu1 %v2125_v15  ;;  %1950 = vmatprep.subr.bf16.mxu0 %v2126_v24  ;;  %v2165_v15 = vld [vmem:[%s2699_s1 + $0x388] sm:$0xff]  }
  0x42   :  { %1978 = vmatprep.subr.bf16.mxu1 %v2127_v25  ;;  %v2168_v25 = vld [vmem:[%s2699_s1 + $0x310] sm:$0xff]  }
  0x43   :  { %1369 = vmatmul.mubr.bf16.vlgmr.msra.gmra.mrb[8].mxu0 %v1663_v20  ;;  %v2166_v20 = vld [vmem:[%s2699_s1 + $0x350] sm:$0xff]  }
  0x44   :  { %1418 = vmatmul.mubr.bf16.vlgmr.msra.gmra.mrb[8].mxu1 %v1665_v22  ;;  %1951 = vmatpush3.bf16.msra.mxu0 %v2128_v26  ;;  %v36_v22 = vld [vmem:[%s2700_s0 + $0xa8] sm:$0xff] }
  0x45   :  { %1979 = vmatpush3.bf16.msra.mxu1 %v2129_v27  ;;  %1952 = vmatprep.subr.bf16.mxu0 %v2130_v28  ;;  %v1686_v24 = vcombine.high %v36_v22, %v44_v23  ;;  %v1685_v26 = vcombine.low %v36_v22, %v44_v23  ;;  %v2169_v27 = vld [vmem:[%s2699_s1 + $0x390] sm:$0xff]   ;;  %v2170_v28 = vld [vmem:[%s2699_s1 + $0x358] sm:$0xff]  }
  0x46   :  { %1980 = vmatprep.subr.bf16.mxu1 %v2131_v29  ;;  %1376 = vmatprep.mubr.bf16.mxu0 %v1680_v34  ;;  %v2171_v29 = vld [vmem:[%s2699_s1 + $0x3d8] sm:$0xff]   ;;  %v2176_v34 = vld [vmem:[%s2699_s1 + $0x320] sm:$0xff]  }
  0x47   :  { %1425 = vmatprep.mubr.bf16.mxu1 %v1682_v40  ;;  %v2182_v40 = vld [vmem:[%s2699_s1 + $0x370] sm:$0xff]  }
  0x48   :  { %1953 = vmatpush3.bf16.msra.mxu0 %v2132_v30  ;;  %v2172_v30 = vld [vmem:[%s2699_s1 + $0x318] sm:$0xff]  }
  0x49   :  { %1981 = vmatpush3.bf16.msra.mxu1 %v2133_v31  ;;  %1954 = vmatprep.subr.bf16.mxu0 %v2134_v36  ;;  %v2173_v31 = vld [vmem:[%s2699_s1 + $0x398] sm:$0xff]   ;;  %v2178_v36 = vld [vmem:[%s2699_s1 + $0x368] sm:$0xff]  }
  0x4a   :  { %1982 = vmatprep.subr.bf16.mxu1 %v2135_v37  ;;  %v2179_v37 = vld [vmem:[%s2699_s1 + $0x3e8] sm:$0xff]  }
  0x4b   :  { %1377 = vmatmul.mubr.bf16.gmra.mrb[12].mxu0 %v1679_v35  ;;  %v2177_v35 = vld [vmem:[%s2699_s1 + $0x3a0] sm:$0xff]  }
  0x4c   :  { %1955 = vmatpush3.bf16.msra.mxu0 %v2136_v41  ;;  %1426 = vmatmul.mubr.bf16.gmra.mrb[12].mxu1 %v1681_v42  ;;  %v2183_v41 = vld [vmem:[%s2699_s1 + $0x3f0] sm:$0xff]  }
  0x4d   :  { %1983 = vmatpush3.bf16.msra.mxu1 %v2137_v43  ;;  %1956 = vmatprep.subr.bf16.mxu0 %v2138_v44  ;;  %v2184_v42 = vld [vmem:[%s2699_s1 + $0x330] sm:$0xff]   ;;  %v2186_v44 = vld [vmem:[%s2699_s1 + $0x378] sm:$0xff]  }
  0x4e   :  { %1984 = vmatprep.subr.bf16.mxu1 %v2139_v45  ;;  %1466 = vmatprep.mubr.bf16.mxu0 %v1668_v3  ;;  %v2185_v43 = vld [vmem:[%s2699_s1 + $0x3b0] sm:$0xff]   ;;  %v2187_v45 = vld [vmem:[%s2699_s1 + $0x3f8] sm:$0xff]  }
  0x4f   :  { %1515 = vmatprep.mubr.bf16.mxu1 %v1670_v7 }
  0x50   :  { %1957 = vmatpush3.bf16.msra.mxu0 %v2140_v46  ;;  %v2188_v46 = vld [vmem:[%s2699_s1 + $0x338] sm:$0xff]  }
  0x51   :  { %1985 = vmatpush3.bf16.msra.mxu1 %v2141_v47  ;;  %1958 = vmatprep.subr.bf16.mxu0 %v2142_v48  ;;  %v2189_v47 = vld [vmem:[%s2699_s1 + $0x3b8] sm:$0xff]   ;;  %v21_v48 = vld [vmem:[%s2700_s0 + $0x30] sm:$0xff] }
  0x52   :  { %1986 = vmatprep.subr.bf16.mxu1 %v2143_v49  ;;  %v29_v49 = vld [vmem:[%s2700_s0 + $0x70] sm:$0xff] }
  0x54   :  { %1959 = vmatpush3.bf16.msra.mxu0 %v2144_v50  ;;  %v22_v50 = vld [vmem:[%s2700_s0 + $0x38] sm:$0xff] }
  0x55   :  { %1987 = vmatpush3.bf16.msra.mxu1 %v2145_v51  ;;  %1960 = vmatprep.subr.bf16.mxu0 %v2146_v52  ;;  %v1671_v51 = vcombine.low %v21_v48, %v29_v49  ;;  %v1672_v52 = vcombine.high %v21_v48, %v29_v49 }
  0x56   :  { %1988 = vmatprep.subr.bf16.mxu1 %v2147_v53  ;;  %v30_v53 = vld [vmem:[%s2700_s0 + $0x78] sm:$0xff] }
  0x58   :  { %1961 = vmatpush3.bf16.msra.mxu0 %v2148_v54  ;;  %v37_v54 = vld [vmem:[%s2700_s0 + $0xb0] sm:$0xff] }
  0x59   :  { %1989 = vmatpush3.bf16.msra.mxu1 %v2149_v55  ;;  %1962 = vmatprep.subr.bf16.mxu0 %v2150_v56  ;;  %v45_v55 = vld [vmem:[%s2700_s0 + $0xf0] sm:$0xff]  ;;  %v1673_v56 = vcombine.low %v22_v50, %v30_v53 }
  0x5a   :  { %1990 = vmatprep.subr.bf16.mxu1 %v2151_v57  ;;  %v1674_v57 = vcombine.high %v22_v50, %v30_v53 }
  0x5c   :  { %1963 = vmatpush3.bf16.msra.mxu0 %v2152_v58  ;;  %v1688_v58 = vcombine.high %v37_v54, %v45_v55 }
  0x5d   :  { %1991 = vmatpush3.bf16.msra.mxu1 %v2153_v59  ;;  %1964 = vmatprep.subr.bf16.mxu0 %v2154_v60  ;;  %v38_v59 = vld [vmem:[%s2700_s0 + $0xb8] sm:$0xff] }
  0x5e   :  { %1992 = vmatprep.subr.bf16.mxu1 %v2155_v61  ;;  %v46_v60 = vld [vmem:[%s2700_s0 + $0xf8] sm:$0xff] }
  0x5f   :  { %v1690_v61 = vcombine.high %v38_v59, %v46_v60 }
  0x60   :  { %1965 = vmatpush3.bf16.msra.mxu0 %v2156_v62  ;;  %v1687_v62 = vcombine.low %v37_v54, %v45_v55 }
  0x61   :  { %1993 = vmatpush3.bf16.msra.mxu1 %v2157_v63  ;;  %2006 = vmatprep.subr.bf16.mxu0 %v2158_v8  ;;  %v1689_v63 = vcombine.low %v38_v59, %v46_v60 }
  0x62   :  { %2034 = vmatprep.subr.bf16.mxu1 %v2159_v9 }
  0x63   :  { %1467 = vmatmul.mubr.bf16.vlgmr.msra.gmra.mrb[16].mxu0 %v1667_v2  ;;  %v1658_v2 = vld [vmem:[%s2701_s2] ss:$0 sm:$0xff] }
  0x64   :  { %1516 = vmatmul.mubr.bf16.vlgmr.msra.gmra.mrb[16].mxu1 %v1669_v6  ;;  %2007 = vmatpush3.bf16.msra.mxu0 %v2160_v10 }
  0x65   :  { %2035 = vmatpush3.bf16.msra.mxu1 %v2161_v11  ;;  %2008 = vmatprep.subr.bf16.mxu0 %v2162_v12 }
  0x66   :  { %2036 = vmatprep.subr.bf16.mxu1 %v2163_v13  ;;  %1474 = vmatprep.mubr.bf16.mxu0 %v1684_v18 }
  0x67   :  { %1523 = vmatprep.mubr.bf16.mxu1 %v1686_v24 }
  0x68   :  { %2009 = vmatpush3.bf16.msra.mxu0 %v2164_v14 }
  0x69   :  { %2037 = vmatpush3.bf16.msra.mxu1 %v2165_v15  ;;  %2010 = vmatprep.subr.bf16.mxu0 %v2166_v20 }
  0x6a   :  { %2038 = vmatprep.subr.bf16.mxu1 %v2167_v21 }
  0x6b   :  { %1475 = vmatmul.mubr.bf16.gmra.mrb[20].mxu0 %v1683_v19 }
  0x6c   :  { %2011 = vmatpush3.bf16.msra.mxu0 %v2168_v25  ;;  %1524 = vmatmul.mubr.bf16.gmra.mrb[20].mxu1 %v1685_v26 }
  0x6d   :  { %2039 = vmatpush3.bf16.msra.mxu1 %v2169_v27  ;;  %2012 = vmatprep.subr.bf16.mxu0 %v2170_v28 }
  0x6e   :  { %2040 = vmatprep.subr.bf16.mxu1 %v2171_v29  ;;  %1564 = vmatprep.mubr.bf16.mxu0 %v1672_v52 }
  0x6f   :  { %1613 = vmatprep.mubr.bf16.mxu1 %v1674_v57 }
  0x70   :  { %2013 = vmatpush3.bf16.msra.mxu0 %v2172_v30 }
  0x71   :  { %2041 = vmatpush3.bf16.msra.mxu1 %v2173_v31  ;;  %2014 = vmatprep.subr.bf16.mxu0 %v2174_v32 }
  0x72   :  { %2042 = vmatprep.subr.bf16.mxu1 %v2175_v33 }
  0x74   :  { %2015 = vmatpush3.bf16.msra.mxu0 %v2176_v34 }
  0x75   :  { %2043 = vmatpush3.bf16.msra.mxu1 %v2177_v35  ;;  %2016 = vmatprep.subr.bf16.mxu0 %v2178_v36 }
  0x76   :  { %2044 = vmatprep.subr.bf16.mxu1 %v2179_v37 }
  0x78   :  { %2017 = vmatpush3.bf16.msra.mxu0 %v2180_v38 }
  0x79   :  { %2045 = vmatpush3.bf16.msra.mxu1 %v2181_v39  ;;  %2018 = vmatprep.subr.bf16.mxu0 %v2182_v40 }
  0x7a   :  { %2046 = vmatprep.subr.bf16.mxu1 %v2183_v41 }
  0x7c   :  { %2019 = vmatpush3.bf16.msra.mxu0 %v2184_v42 }
  0x7d   :  { %2047 = vmatpush3.bf16.msra.mxu1 %v2185_v43  ;;  %2020 = vmatprep.subr.bf16.mxu0 %v2186_v44 }
  0x7e   :  { %2048 = vmatprep.subr.bf16.mxu1 %v2187_v45 }
  0x80   :  { %2021 = vmatpush3.bf16.msra.mxu0 %v2188_v46 }
  0x81   :  { %2049 = vmatpush3.bf16.msra.mxu1 %v2189_v47 }
  0x83   :  { %1565 = vmatmul.mubr.bf16.vlgmr.msra.gmra.mrb[24].mxu0 %v1671_v51 }
  0x84   :  { %1614 = vmatmul.mubr.bf16.vlgmr.msra.gmra.mrb[24].mxu1 %v1673_v56  ;;  %1572 = vmatprep.mubr.bf16.mxu0 %v1688_v58 }
  0x85   :  { %1621 = vmatprep.mubr.bf16.mxu1 %v1690_v61 }
  0x8b   :  { %1573 = vmatmul.mubr.bf16.gmra.mrb[28].mxu0 %v1687_v62 }
  0x8c   :  { %1622 = vmatmul.mubr.bf16.gmra.mrb[28].mxu1 %v1689_v63 }
  0xf6   :  { %v1854_v0 = vpop.f32.mrb[0].mxu0 }
  0xf7   :  { %v1882_v1 = vpop.f32.mrb[0].mxu1  ;;  %v1855_v3 = vpop.f32.mrb[1].mxu0 }
  0xf8   :  { %v1856_v4 = vadd.f32 %v1855_v3, %v1854_v0  ;;  %v1883_v5 = vpop.f32.mrb[1].mxu1  ;;  %v1857_v6 = vpop.f32.mrb[2].mxu0 }
  0xf9   :  { %v1884_v7 = vadd.f32 %v1883_v5, %v1882_v1  ;;  %v1885_v8 = vpop.f32.mrb[2].mxu1  ;;  %v1858_v9 = vpop.f32.mrb[3].mxu0 }
  0xfa   :  { %v1273_v10 = vadd.f32 %v1856_v4, %v1658_v2  ;;  %v1859_v11 = vadd.f32 %v1858_v9, %v1857_v6  ;;  %v1886_v12 = vpop.f32.mrb[3].mxu1 }
  0xfb   :  { %v1887_v13 = vadd.f32 %v1886_v12, %v1885_v8 }
  0xfc   :  { %v1322_v14 = vadd.f32 %v1884_v7, %v1273_v10  ;;  %v1276_v15 = vadd.f32 %v1859_v11, %v1658_v2 }
  0xfe   :  { %v1325_v16 = vadd.f32 %v1887_v13, %v1276_v15  ;;  %v1860_v17 = vpop.f32.mrb[4].mxu0 }
  0xff   :  { %v1861_v18 = vpop.f32.mrb[5].mxu0  ;;  %v1888_v21 = vpop.f32.mrb[4].mxu1 }
 0x100   :  { %v1862_v19 = vadd.f32 %v1861_v18, %v1860_v17  ;;  %v1863_v20 = vpop.f32.mrb[6].mxu0  ;;  %v1889_v25 = vpop.f32.mrb[5].mxu1 }
 0x101   :  { %v1864_v22 = vpop.f32.mrb[7].mxu0  ;;  %v1890_v26 = vadd.f32 %v1889_v25, %v1888_v21  ;;  %v1891_v27 = vpop.f32.mrb[6].mxu1 }
 0x102   :  { %v1281_v23 = vadd.f32 %v1862_v19, %v1658_v2  ;;  %v1865_v24 = vadd.f32 %v1864_v22, %v1863_v20  ;;  %v1892_v29 = vpop.f32.mrb[7].mxu1 }
 0x103   :  { %v1893_v31 = vadd.f32 %v1892_v29, %v1891_v27 }
 0x104   :  { %v1284_v28 = vadd.f32 %v1865_v24, %v1658_v2  ;;  %v1330_v30 = vadd.f32 %v1890_v26, %v1281_v23 }
 0x106   :  { %v1333_v32 = vadd.f32 %v1893_v31, %v1284_v28 }
 0x116   :  { %v1910_v33 = vpop.f32.mrb[8].mxu0 }
 0x117   :  { %v1938_v34 = vpop.f32.mrb[8].mxu1  ;;  %v1911_v35 = vpop.f32.mrb[9].mxu0 }
 0x118   :  { %v1939_v36 = vpop.f32.mrb[9].mxu1  ;;  %v1912_v37 = vadd.f32 %v1911_v35, %v1910_v33  ;;  %v1913_v39 = vpop.f32.mrb[10].mxu0 }
 0x119   :  { %v1940_v38 = vadd.f32 %v1939_v36, %v1938_v34  ;;  %v1941_v40 = vpop.f32.mrb[10].mxu1  ;;  %v1914_v41 = vpop.f32.mrb[11].mxu0 }
 0x11a   :  { %v1942_v42 = vpop.f32.mrb[11].mxu1  ;;  %v1371_v43 = vadd.f32 %v1912_v37, %v1322_v14  ;;  %v1915_v44 = vadd.f32 %v1914_v41, %v1913_v39 }
 0x11b   :  { %v1943_v45 = vadd.f32 %v1942_v42, %v1941_v40 }
 0x11c   :  { %v1420_v46 = vadd.f32 %v1940_v38, %v1371_v43  ;;  %v1374_v47 = vadd.f32 %v1915_v44, %v1325_v16 }
 0x11e   :  { %v1423_v48 = vadd.f32 %v1943_v45, %v1374_v47  ;;  %v1916_v49 = vpop.f32.mrb[12].mxu0 }
 0x11f   :  { %v1917_v50 = vpop.f32.mrb[13].mxu0  ;;  %v1944_v55 = vpop.f32.mrb[12].mxu1 }
 0x120   :  { %v1918_v51 = vadd.f32 %v1917_v50, %v1916_v49  ;;  %v1919_v52 = vpop.f32.mrb[14].mxu0  ;;  %v1945_v57 = vpop.f32.mrb[13].mxu1 }
 0x121   :  { %v1920_v53 = vpop.f32.mrb[15].mxu0  ;;  %v1946_v59 = vadd.f32 %v1945_v57, %v1944_v55  ;;  %v1947_v60 = vpop.f32.mrb[14].mxu1 }
 0x122   :  { %v1379_v54 = vadd.f32 %v1918_v51, %v1330_v30  ;;  %v1921_v56 = vadd.f32 %v1920_v53, %v1919_v52  ;;  %v1948_v61 = vpop.f32.mrb[15].mxu1 }
 0x123   :  { %v1949_v63 = vadd.f32 %v1948_v61, %v1947_v60 }
 0x124   :  { %v1382_v58 = vadd.f32 %v1921_v56, %v1333_v32  ;;  %v1428_v62 = vadd.f32 %v1946_v59, %v1379_v54 }
 0x126   :  { %v1431_v0 = vadd.f32 %v1949_v63, %v1382_v58 }
 0x136   :  { %v1966_v1 = vpop.f32.mrb[16].mxu0 }
 0x137   :  { %v1994_v2 = vpop.f32.mrb[16].mxu1  ;;  %v1967_v3 = vpop.f32.mrb[17].mxu0 }
 0x138   :  { %v1968_v4 = vadd.f32 %v1967_v3, %v1966_v1  ;;  %v1995_v5 = vpop.f32.mrb[17].mxu1  ;;  %v1969_v6 = vpop.f32.mrb[18].mxu0 }
 0x139   :  { %v1996_v7 = vadd.f32 %v1995_v5, %v1994_v2  ;;  %v1997_v8 = vpop.f32.mrb[18].mxu1  ;;  %v1970_v9 = vpop.f32.mrb[19].mxu0 }
 0x13a   :  { %v1469_v10 = vadd.f32 %v1968_v4, %v1420_v46  ;;  %v1971_v11 = vadd.f32 %v1970_v9, %v1969_v6  ;;  %v1998_v12 = vpop.f32.mrb[19].mxu1 }
 0x13b   :  { %v1999_v13 = vadd.f32 %v1998_v12, %v1997_v8 }
 0x13c   :  { %v1518_v14 = vadd.f32 %v1996_v7, %v1469_v10  ;;  %v1472_v15 = vadd.f32 %v1971_v11, %v1423_v48 }
 0x13e   :  { %v1521_v16 = vadd.f32 %v1999_v13, %v1472_v15  ;;  %v1972_v17 = vpop.f32.mrb[20].mxu0 }
 0x13f   :  { %v1973_v18 = vpop.f32.mrb[21].mxu0  ;;  %v2000_v21 = vpop.f32.mrb[20].mxu1 }
 0x140   :  { %v1974_v19 = vadd.f32 %v1973_v18, %v1972_v17  ;;  %v1975_v20 = vpop.f32.mrb[22].mxu0  ;;  %v2001_v25 = vpop.f32.mrb[21].mxu1 }
 0x141   :  { %v1976_v22 = vpop.f32.mrb[23].mxu0  ;;  %v2002_v26 = vadd.f32 %v2001_v25, %v2000_v21  ;;  %v2003_v27 = vpop.f32.mrb[22].mxu1 }
 0x142   :  { %v1477_v23 = vadd.f32 %v1974_v19, %v1428_v62  ;;  %v1977_v24 = vadd.f32 %v1976_v22, %v1975_v20  ;;  %v2004_v29 = vpop.f32.mrb[23].mxu1 }
 0x143   :  { %v2005_v31 = vadd.f32 %v2004_v29, %v2003_v27 }
 0x144   :  { %v1480_v28 = vadd.f32 %v1977_v24, %v1431_v0  ;;  %v1526_v30 = vadd.f32 %v2002_v26, %v1477_v23 }
 0x146   :  { %v1529_v32 = vadd.f32 %v2005_v31, %v1480_v28 }
 0x156   :  { %v2022_v33 = vpop.f32.mrb[24].mxu0 }
 0x157   :  { %v2050_v34 = vpop.f32.mrb[24].mxu1  ;;  %v2023_v35 = vpop.f32.mrb[25].mxu0 }
 0x158   :  { %v2024_v36 = vadd.f32 %v2023_v35, %v2022_v33  ;;  %v2051_v37 = vpop.f32.mrb[25].mxu1  ;;  %v2025_v38 = vpop.f32.mrb[26].mxu0 }
 0x159   :  { %v2052_v39 = vadd.f32 %v2051_v37, %v2050_v34  ;;  %v2053_v40 = vpop.f32.mrb[26].mxu1  ;;  %v2026_v41 = vpop.f32.mrb[27].mxu0 }
 0x15a   :  { %v1567_v42 = vadd.f32 %v2024_v36, %v1518_v14  ;;  %v2027_v43 = vadd.f32 %v2026_v41, %v2025_v38  ;;  %v2054_v44 = vpop.f32.mrb[27].mxu1 }
 0x15b   :  { %v2055_v45 = vadd.f32 %v2054_v44, %v2053_v40 }
 0x15c   :  { %v1616_v46 = vadd.f32 %v2052_v39, %v1567_v42  ;;  %v1570_v47 = vadd.f32 %v2027_v43, %v1521_v16 }
 0x15e   :  { %v1619_v48 = vadd.f32 %v2055_v45, %v1570_v47  ;;  %v2028_v49 = vpop.f32.mrb[28].mxu0  ;;  %v1630_v52 = vmax.f32 %v1616_v46, 0.0 }
 0x15f   :  { %v2056_v50 = vpop.f32.mrb[28].mxu1  ;;  %v2029_v51 = vpop.f32.mrb[29].mxu0 }
 0x160   :  { %v1631_v53 = vmax.f32 %v1619_v48, 0.0  ;;  %v2030_v54 = vadd.f32 %v2029_v51, %v2028_v49  ;;  %v2057_v55 = vpop.f32.mrb[29].mxu1  ;;  %v2031_v56 = vpop.f32.mrb[30].mxu0 }
 0x161   :  { %v2058_v57 = vadd.f32 %v2057_v55, %v2056_v50  ;;  %v2059_v58 = vpop.f32.mrb[30].mxu1  ;;  %v2032_v59 = vpop.f32.mrb[31].mxu0 }
 0x162   :  { %v1830_v60 = vpack.c.bf16 %v1631_v53, %v1630_v52  ;;  %v1575_v61 = vadd.f32 %v2030_v54, %v1526_v30  ;;  %v2033_v62 = vadd.f32 %v2032_v59, %v2031_v56  ;;  %v2060_v63 = vpop.f32.mrb[31].mxu1 }
 0x163   :  { %v2061_v0 = vadd.f32 %v2060_v63, %v2059_v58 }
 0x164   :  { %1831 = vst [vmem:[%s2702_s3] sm:$0xff] %v1830_v60   ;;  %v1624_v1 = vadd.f32 %v2058_v57, %v1575_v61  ;;  %v1578_v2 = vadd.f32 %v2033_v62, %v1529_v32 }
 0x166   :  { %v1627_v3 = vadd.f32 %v2061_v0, %v1578_v2  ;;  %v1632_v4 = vmax.f32 %v1624_v1, 0.0 }
 0x168   :  { %v1633_v5 = vmax.f32 %v1627_v3, 0.0 }
 0x16a   :  { %v1835_v6 = vpack.c.bf16 %v1633_v5, %v1632_v4 }
 0x16c   :  { %1837 = vst [vmem:[%s2702_s3 + $0x8] sm:$0xff] %v1835_v6  }

</bundles_post_ra>
